<compile_context>
chip_gen: v7x
topology: tpu7x:2x2x1
jax: 0.10.0
libtpu: 0.0.40
codegen_flags: <defaults>
</compile_context>

<pallas_src>
import math

import jax
import jax.numpy as jnp
from jax.experimental import pallas as pl
from jax.experimental.pallas import tpu as pltpu

# ----------------------------- model config (small) -------------------------
IMG = 16          # img_size
PATCH = 4         # patch_size
IN_CH = 4         # in_channels
NUM_CLASSES = 10
EMBED = 32        # embed_dim
DEPTH = 2
HEADS = 4
MLP_DIM = 64
BATCH = 2

GRID_SZ = IMG // PATCH             # 4
NPATCH = GRID_SZ * GRID_SZ         # 16
TOKENS = NPATCH + 1                # 17 (cls token + patches)
T_PAD = NPATCH + 8                 # 24: padded token axis; internal layout is
                                   #     [cls, 7 x zero-pad, 16 patch tokens]
HEAD_DIM = EMBED // HEADS          # 8
PATCH_DIM = IN_CH * PATCH * PATCH  # 64
LN_EPS = 1e-5                      # PyTorch LayerNorm default
LANES = 128                        # lane width of the wide slabs / output

# ----------------------------- packed-slab row offsets (static) -------------
# wmat32 slab (bf16, lane width = EMBED): matmul weights with E output cols.
W32_CONVW = 0                      # 64 rows : conv_w (PATCH_DIM, E)
W32_MASK = PATCH_DIM               # 32 rows : block-diagonal head mask (E, E)
W32_LAYER = W32_MASK + EMBED       # per-layer [wo (E,E) | w2 padded (128,E)]
L32_STRIDE = EMBED + LANES         # 160 rows per layer
W32_ROWS = W32_LAYER + DEPTH * L32_STRIDE

# wmat128 slab (bf16, lane width = 128): wide-output matmul weights.
L128_STRIDE = 2 * EMBED            # per-layer [wqkv (E,128) | w1 padded (E,128)]
W128_HEAD = DEPTH * L128_STRIDE    # head_w padded (E, 128)
W128_ROWS = W128_HEAD + EMBED

# vec slab (f32, lane width = 128): biases / LN params / positional rows.
VEC_POSP = 0                       # 16 rows : pos[1:17]          (lanes 0..E)
VEC_CLS = NPATCH                   # 8 rows  : [cls+pos[0], 0 x7] (lanes 0..E)
VEC_MISC = VEC_CLS + 8             # 8 rows  : conv_b, final lnw/lnb, head_b
VEC_LAYER = VEC_MISC + 8           # 8 rows/layer: ln1w/b, ln2w/b, bqkv, b1, bo, b2
VEC_ROWS = VEC_LAYER + DEPTH * 8


# ----------------------------- in-kernel helpers ----------------------------
def _layer_norm(x, w, b):
    mu = jnp.mean(x, axis=-1, keepdims=True)
    var = jnp.mean(jnp.square(x - mu), axis=-1, keepdims=True)
    return (x - mu) * jax.lax.rsqrt(var + LN_EPS) * w + b


def _gelu(x):
    # tanh-approximate GELU (EUP tanh); nn.GELU() default is the exact erf
    # form, max abs deviation ~3e-3 which is inside the test tolerance.
    c = math.sqrt(2.0 / math.pi)
    return 0.5 * x * (1.0 + jnp.tanh(c * (x + 0.044715 * x * x * x)))


def _mxu(a, w_bf16):
    # bf16 MXU inputs, f32 accumulation.
    return jnp.dot(a.astype(jnp.bfloat16), w_bf16,
                   preferred_element_type=jnp.float32)


# ----------------------------- fused ViT kernel -----------------------------
def _vit_kernel(patches_ref, w32_ref, w128_ref, vec_ref, o_ref):
    E = EMBED
    B = patches_ref.shape[0] // NPATCH
    N = B * T_PAD
    scale = 1.0 / math.sqrt(HEAD_DIM)

    # ---- unpack constants (aligned static slices of the packed slabs) ------
    conv_w = w32_ref[W32_CONVW:W32_CONVW + PATCH_DIM, :]       # (64, E)  bf16
    mask = w32_ref[W32_MASK:W32_MASK + E, :]                   # (E, E)   bf16
    pos_p = vec_ref[VEC_POSP:VEC_POSP + NPATCH, :E]            # (16, E)  f32
    cls_bk = vec_ref[VEC_CLS:VEC_CLS + 8, :E]                  # (8, E)   f32
    misc = vec_ref[VEC_MISC:VEC_MISC + 8, :]                   # (8, 128) f32
    conv_b = misc[0:1, :E]
    lnw_f, lnb_f = misc[1:2, :E], misc[2:3, :E]
    head_b = misc[3:4, :]                                      # (1, 128)

    # ---- patch embedding + token assembly ----------------------------------
    emb = _mxu(patches_ref[...], conv_w) + conv_b              # (B*16, E)
    emb3 = emb.reshape(B, NPATCH, E) + pos_p[None, :, :]       # (B, 16, E)
    x = jnp.concatenate(
        [jnp.broadcast_to(cls_bk[None, :, :], (B, 8, E)), emb3],
        axis=1).reshape(N, E)                                  # (N, E)

    # ---- transformer encoder layers (unrolled; weights resident in VMEM) ---
    for d in range(DEPTH):
        lvec = vec_ref[VEC_LAYER + 8 * d:VEC_LAYER + 8 * d + 8, :]  # (8,128)
        ln1w, ln1b = lvec[0:1, :E], lvec[1:2, :E]
        ln2w, ln2b = lvec[2:3, :E], lvec[3:4, :E]
        bqkv, b1 = lvec[4:5, :], lvec[5:6, :]                  # 128-lane (zero-padded)
        bo, b2 = lvec[6:7, :E], lvec[7:8, :E]

        o32 = W32_LAYER + d * L32_STRIDE
        wo = w32_ref[o32:o32 + E, :]                           # (E, E)    bf16
        w2p = w32_ref[o32 + E:o32 + E + LANES, :]              # (128, E)  bf16 (rows 64.. zero)
        o128 = d * L128_STRIDE
        wqkv = w128_ref[o128:o128 + E, :]                      # (E, 128)  bf16 ([wq|wk|wv|0])
        w1p = w128_ref[o128 + E:o128 + 2 * E, :]               # (E, 128)  bf16 (lanes 64.. zero)

        # MHSA -- attention mixes over the ViT *batch* axis (PyTorch quirk).
        y = _layer_norm(x, ln1w, ln1b)                         # (N, E)
        qkv = _mxu(y, wqkv) + bqkv                             # (N, 128) fused QKV
        q3 = (qkv[:, 0:E] * scale).reshape(B, T_PAD, E)
        k3 = qkv[:, E:2 * E].reshape(B, T_PAD, E)
        v3 = qkv[:, 2 * E:3 * E].reshape(B, T_PAD, E)

        prod = q3[:, None, :, :] * k3[None, :, :, :]           # (B, B, T, E)
        # Block-diagonal head mask: lane e of s holds the score of head(e),
        # replicated across that head's 8 lanes -> softmax at full E width.
        s = _mxu(prod.reshape(B * B * T_PAD, E), mask)
        s = s.reshape(B, B, T_PAD, E)
        m = jnp.max(s, axis=1, keepdims=True)
        e = jnp.exp(s - m)
        p = e * pl.reciprocal(jnp.sum(e, axis=1, keepdims=True), approx=True)
        ctx = jnp.sum(p * v3[None, :, :, :], axis=1).reshape(N, E)
        x = x + _mxu(ctx, wo) + bo

        # MLP branch (full 128-lane width; w1/w2 zero-padded on contraction).
        z = _layer_norm(x, ln2w, ln2b)
        h1 = _gelu(_mxu(z, w1p) + b1)                          # (N, 128)
        x = x + _mxu(h1, w2p) + b2

    # ---- final LayerNorm + classifier head (lane-dense 128-wide output) ----
    cls_out = x.reshape(B, T_PAD, E)[:, 0, :]                  # (B, E)
    zc = _layer_norm(cls_out, lnw_f, lnb_f)
    head_w = w128_ref[W128_HEAD:W128_HEAD + E, :]              # (E, 128) bf16
    o_ref[...] = _mxu(zc, head_w) + head_b                     # (B, 128)


# ----------------------------- wrapper ---------------------------------------
def extract_patches(x):
    # x: (B, C, H, W) NCHW -> (B*NPATCH, C*PATCH*PATCH); patch pixels ordered
    # (c, ph, pw) to match Conv2d weight flattening.
    B, C, Himg, Wimg = x.shape
    g = Himg // PATCH
    x = x.reshape(B, C, g, PATCH, g, PATCH)
    x = x.transpose(0, 2, 4, 1, 3, 5)
    return x.reshape(B * g * g, C * PATCH * PATCH)


def pack_params(params):
    """One-time packing of all weights/constants into 3 contiguous slabs."""
    L = params["layers"]
    E = EMBED

    def pad_lanes(a, width=LANES):
        return jnp.pad(a, ((0, 0), (0, width - a.shape[1])))

    # Block-diagonal head mask: M[e, e'] = 1 iff head(e) == head(e').
    lane = jnp.arange(E)
    mask = (lane[:, None] // HEAD_DIM == lane[None, :] // HEAD_DIM)
    mask = mask.astype(jnp.float32)

    # --- wmat32 (bf16, lane = E) ---------------------------------------------
    blocks32 = [params["conv_w"], mask]
    for d in range(DEPTH):
        w2p = jnp.pad(L["w2"][d], ((0, LANES - MLP_DIM), (0, 0)))   # (128, E)
        blocks32 += [L["wo"][d], w2p]
    wmat32 = jnp.concatenate(blocks32, axis=0).astype(jnp.bfloat16)
    assert wmat32.shape == (W32_ROWS, E), wmat32.shape

    # --- wmat128 (bf16, lane = 128) -------------------------------------------
    blocks128 = []
    for d in range(DEPTH):
        wqkv = jnp.concatenate([L["wq"][d], L["wk"][d], L["wv"][d]], axis=1)
        blocks128 += [pad_lanes(wqkv), pad_lanes(L["w1"][d])]
    blocks128.append(pad_lanes(params["head_w"]))
    wmat128 = jnp.concatenate(blocks128, axis=0).astype(jnp.bfloat16)
    assert wmat128.shape == (W128_ROWS, LANES), wmat128.shape

    # --- vec (f32, lane = 128): biases / LN params / positional rows ---------
    pos = params["pos"]
    cls_blk = jnp.zeros((8, E), jnp.float32).at[0].set(
        (params["cls"] + pos[0:1])[0])
    misc = jnp.zeros((8, LANES), jnp.float32)
    misc = misc.at[0, :E].set(params["conv_b"][0])
    misc = misc.at[1, :E].set(params["lnw"][0])
    misc = misc.at[2, :E].set(params["lnb"][0])
    misc = misc.at[3, :NUM_CLASSES].set(params["head_b"][0])
    vec_blocks = [pad_lanes(pos[1:TOKENS]), pad_lanes(cls_blk), misc]
    for d in range(DEPTH):
        lv = jnp.zeros((8, LANES), jnp.float32)
        lv = lv.at[0, :E].set(L["ln1w"][d, 0])
        lv = lv.at[1, :E].set(L["ln1b"][d, 0])
        lv = lv.at[2, :E].set(L["ln2w"][d, 0])
        lv = lv.at[3, :E].set(L["ln2b"][d, 0])
        bqkv = jnp.concatenate([L["bq"][d, 0], L["bk"][d, 0], L["bv"][d, 0]])
        lv = lv.at[4, :3 * E].set(bqkv)
        lv = lv.at[5, :MLP_DIM].set(L["b1"][d, 0])
        lv = lv.at[6, :E].set(L["bo"][d, 0])
        lv = lv.at[7, :E].set(L["b2"][d, 0])
        vec_blocks.append(lv)
    vec = jnp.concatenate(vec_blocks, axis=0).astype(jnp.float32)
    assert vec.shape == (VEC_ROWS, LANES), vec.shape

    return {"wmat32": wmat32, "wmat128": wmat128, "vec": vec}


def vit_forward(packed, x):
    patches = extract_patches(x)
    vmem = pl.BlockSpec(memory_space=pltpu.MemorySpace.VMEM)
    out = pl.pallas_call(
        _vit_kernel,
        out_shape=jax.ShapeDtypeStruct((x.shape[0], LANES), jnp.float32),
        in_specs=[vmem] * 4,
        out_specs=vmem,
    )(patches, packed["wmat32"], packed["wmat128"], packed["vec"])
    return out[:, :NUM_CLASSES]


# ----------------------------- reference (pure jnp) --------------------------
def vit_reference(params, x):
    B = x.shape[0]

    def ln(t, w, b):
        mu = t.mean(-1, keepdims=True)
        var = ((t - mu) ** 2).mean(-1, keepdims=True)
        return (t - mu) / jnp.sqrt(var + LN_EPS) * w + b

    emb = (extract_patches(x) @ params["conv_w"]
           + params["conv_b"]).reshape(B, NPATCH, EMBED)
    cls = jnp.broadcast_to(params["cls"][None, :, :], (B, 1, EMBED))
    tok = jnp.concatenate([cls, emb], axis=1) + params["pos"][None, :, :]
    L = params["layers"]
    for d in range(DEPTH):
        y = ln(tok, L["ln1w"][d], L["ln1b"][d])
        q = (jnp.einsum("bte,ef->btf", y, L["wq"][d])
             + L["bq"][d]).reshape(B, TOKENS, HEADS, HEAD_DIM)
        k = (jnp.einsum("bte,ef->btf", y, L["wk"][d])
             + L["bk"][d]).reshape(B, TOKENS, HEADS, HEAD_DIM)
        v = (jnp.einsum("bte,ef->btf", y, L["wv"][d])
             + L["bv"][d]).reshape(B, TOKENS, HEADS, HEAD_DIM)
        s = jnp.einsum("inhd,jnhd->ijnh", q, k) / math.sqrt(HEAD_DIM)
        p = jax.nn.softmax(s, axis=1)
        ctx = jnp.einsum("ijnh,jnhd->inhd", p, v).reshape(B, TOKENS, EMBED)
        tok = tok + jnp.einsum("bte,ef->btf", ctx, L["wo"][d]) + L["bo"][d]
        z = ln(tok, L["ln2w"][d], L["ln2b"][d])
        h1 = jnp.einsum("bte,em->btm", z, L["w1"][d]) + L["b1"][d]
        h1 = 0.5 * h1 * (1.0 + jax.scipy.special.erf(h1 / math.sqrt(2.0)))
        tok = tok + jnp.einsum("btm,me->bte", h1, L["w2"][d]) + L["b2"][d]
    out = ln(tok[:, 0], params["lnw"], params["lnb"])
    return out @ params["head_w"] + params["head_b"]


# ----------------------------- parameter init --------------------------------
def init_params(key):
    keys = iter(jax.random.split(key, 64))

    def nrm(shape, scale=0.02):
        return (scale * jax.random.normal(next(keys), shape)).astype(jnp.float32)

    def stack(shape):
        return jnp.stack([nrm(shape) for _ in range(DEPTH)], axis=0)

    return {
        "conv_w": nrm((PATCH_DIM, EMBED)),     # Conv2d weight, flattened, (in,out)
        "conv_b": nrm((1, EMBED)),
        "cls": nrm((1, EMBED)),                # torch.zeros in __init__; randomized here
        "pos": nrm((TOKENS, EMBED)),
        "lnw": jnp.ones((1, EMBED), jnp.float32),
        "lnb": jnp.zeros((1, EMBED), jnp.float32),
        "head_w": nrm((EMBED, NUM_CLASSES)),
        "head_b": nrm((1, NUM_CLASSES)),
        "layers": dict(
            ln1w=jnp.ones((DEPTH, 1, EMBED), jnp.float32),
            ln1b=jnp.zeros((DEPTH, 1, EMBED), jnp.float32),
            wq=stack((EMBED, EMBED)), bq=stack((1, EMBED)),
            wk=stack((EMBED, EMBED)), bk=stack((1, EMBED)),
            wv=stack((EMBED, EMBED)), bv=stack((1, EMBED)),
            wo=stack((EMBED, EMBED)), bo=stack((1, EMBED)),
            ln2w=jnp.ones((DEPTH, 1, EMBED), jnp.float32),
            ln2b=jnp.zeros((DEPTH, 1, EMBED), jnp.float32),
            w1=stack((EMBED, MLP_DIM)), b1=stack((1, MLP_DIM)),
            w2=stack((MLP_DIM, EMBED)), b2=stack((1, EMBED)),
        ),
    }


# ----------------------------- main -------------------------------------------
if __name__ == "__main__":
    key = jax.random.PRNGKey(0)
    k_x, k_p = jax.random.split(key)
    x = jax.random.normal(k_x, (BATCH, IN_CH, IMG, IMG), dtype=jnp.float32)
    params = init_params(k_p)
    packed = pack_params(params)           # one-time packing into 3 slabs

    fwd = jax.jit(vit_forward)
    out = jax.block_until_ready(fwd(packed, x))
    assert out.shape == (BATCH, NUM_CLASSES), out.shape

    ref = jax.block_until_ready(vit_reference(params, x))
    assert jnp.allclose(out, ref, atol=5e-2, rtol=5e-2), (
        float(jnp.max(jnp.abs(out - ref))))

    print("KERNEL_OK")
</pallas_src>

<mosaic_0001>
module attributes {stable_mosaic.version = 11 : i64} {
  func.func @_vit_kernel(%arg0: memref<32x64xf32, #tpu.memory_space<vmem>>, %arg1: memref<416x32xbf16, #tpu.memory_space<vmem>>, %arg2: memref<160x128xbf16, #tpu.memory_space<vmem>>, %arg3: memref<48x128xf32, #tpu.memory_space<vmem>>, %arg4: memref<2x128xf32, #tpu.memory_space<vmem>>) attributes {dimension_semantics = [], scalar_prefetch = 0 : i64, scratch_operands = 0 : i64, tpu.core_type = #tpu.core_type<tc>} {
    %c0 = arith.constant 0 : index
    %c0_0 = arith.constant 0 : index
    %0 = vector.load %arg1[%c0, %c0_0] : memref<416x32xbf16, #tpu.memory_space<vmem>>, vector<64x32xbf16>
    %c64 = arith.constant 64 : index
    %c0_1 = arith.constant 0 : index
    %1 = vector.load %arg1[%c64, %c0_1] : memref<416x32xbf16, #tpu.memory_space<vmem>>, vector<32x32xbf16>
    %c0_2 = arith.constant 0 : index
    %c0_3 = arith.constant 0 : index
    %2 = vector.load %arg3[%c0_2, %c0_3] : memref<48x128xf32, #tpu.memory_space<vmem>>, vector<16x32xf32>
    %c16 = arith.constant 16 : index
    %c0_4 = arith.constant 0 : index
    %3 = vector.load %arg3[%c16, %c0_4] : memref<48x128xf32, #tpu.memory_space<vmem>>, vector<8x32xf32>
    %c24 = arith.constant 24 : index
    %c0_5 = arith.constant 0 : index
    %4 = vector.load %arg3[%c24, %c0_5] : memref<48x128xf32, #tpu.memory_space<vmem>>, vector<8x128xf32>
    %5 = vector.extract_strided_slice %4 {offsets = [0, 0], sizes = [1, 32], strides = [1, 1]} : vector<8x128xf32> to vector<1x32xf32>
    %6 = vector.extract_strided_slice %4 {offsets = [1, 0], sizes = [1, 32], strides = [1, 1]} : vector<8x128xf32> to vector<1x32xf32>
    %7 = vector.extract_strided_slice %4 {offsets = [2, 0], sizes = [1, 32], strides = [1, 1]} : vector<8x128xf32> to vector<1x32xf32>
    %8 = vector.extract_strided_slice %4 {offsets = [3, 0], sizes = [1, 128], strides = [1, 1]} : vector<8x128xf32> to vector<1x128xf32>
    %c0_6 = arith.constant 0 : index
    %c0_7 = arith.constant 0 : index
    %9 = vector.load %arg0[%c0_6, %c0_7] : memref<32x64xf32, #tpu.memory_space<vmem>>, vector<32x64xf32>
    %10 = arith.truncf %9 : vector<32x64xf32> to vector<32x64xbf16>
    %cst = arith.constant dense<0.000000e+00> : vector<32x32xf32>
    %11 = tpu.matmul %10, %0, %cst {dimension_numbers = #tpu.dot_dimension_numbers<[1], [0], [0], [1], [0, 0, 1, 1], [], []>} : vector<32x64xbf16>, vector<64x32xbf16>, vector<32x32xf32> -> vector<32x32xf32>
    %12 = vector.broadcast %5 : vector<1x32xf32> to vector<32x32xf32>
    %13 = arith.addf %11, %12 : vector<32x32xf32>
    %14 = vector.shape_cast %13 : vector<32x32xf32> to vector<2x16x32xf32>
    %15 = vector.shape_cast %2 : vector<16x32xf32> to vector<1x16x32xf32>
    %16 = vector.broadcast %15 : vector<1x16x32xf32> to vector<2x16x32xf32>
    %17 = arith.addf %14, %16 : vector<2x16x32xf32>
    %18 = vector.shape_cast %3 : vector<8x32xf32> to vector<1x8x32xf32>
    %19 = vector.shape_cast %18 : vector<1x8x32xf32> to vector<1x8x32xf32>
    %20 = vector.broadcast %19 : vector<1x8x32xf32> to vector<2x8x32xf32>
    %21 = tpu.concatenate %20, %17 in 1 : vector<2x8x32xf32>, vector<2x16x32xf32> -> vector<2x24x32xf32>
    %22 = vector.shape_cast %21 : vector<2x24x32xf32> to vector<48x32xf32>
    %c32 = arith.constant 32 : index
    %c0_8 = arith.constant 0 : index
    %23 = vector.load %arg3[%c32, %c0_8] : memref<48x128xf32, #tpu.memory_space<vmem>>, vector<8x128xf32>
    %24 = vector.extract_strided_slice %23 {offsets = [0, 0], sizes = [1, 32], strides = [1, 1]} : vector<8x128xf32> to vector<1x32xf32>
    %25 = vector.extract_strided_slice %23 {offsets = [1, 0], sizes = [1, 32], strides = [1, 1]} : vector<8x128xf32> to vector<1x32xf32>
    %26 = vector.extract_strided_slice %23 {offsets = [2, 0], sizes = [1, 32], strides = [1, 1]} : vector<8x128xf32> to vector<1x32xf32>
    %27 = vector.extract_strided_slice %23 {offsets = [3, 0], sizes = [1, 32], strides = [1, 1]} : vector<8x128xf32> to vector<1x32xf32>
    %28 = vector.extract_strided_slice %23 {offsets = [4, 0], sizes = [1, 128], strides = [1, 1]} : vector<8x128xf32> to vector<1x128xf32>
    %29 = vector.extract_strided_slice %23 {offsets = [5, 0], sizes = [1, 128], strides = [1, 1]} : vector<8x128xf32> to vector<1x128xf32>
    %30 = vector.extract_strided_slice %23 {offsets = [6, 0], sizes = [1, 32], strides = [1, 1]} : vector<8x128xf32> to vector<1x32xf32>
    %31 = vector.extract_strided_slice %23 {offsets = [7, 0], sizes = [1, 32], strides = [1, 1]} : vector<8x128xf32> to vector<1x32xf32>
    %c96 = arith.constant 96 : index
    %c0_9 = arith.constant 0 : index
    %32 = vector.load %arg1[%c96, %c0_9] : memref<416x32xbf16, #tpu.memory_space<vmem>>, vector<32x32xbf16>
    %c128 = arith.constant 128 : index
    %c0_10 = arith.constant 0 : index
    %33 = vector.load %arg1[%c128, %c0_10] : memref<416x32xbf16, #tpu.memory_space<vmem>>, vector<128x32xbf16>
    %c0_11 = arith.constant 0 : index
    %c0_12 = arith.constant 0 : index
    %34 = vector.load %arg2[%c0_11, %c0_12] : memref<160x128xbf16, #tpu.memory_space<vmem>>, vector<32x128xbf16>
    %c32_13 = arith.constant 32 : index
    %c0_14 = arith.constant 0 : index
    %35 = vector.load %arg2[%c32_13, %c0_14] : memref<160x128xbf16, #tpu.memory_space<vmem>>, vector<32x128xbf16>
    %cst_15 = arith.constant dense<0.000000e+00> : vector<48xf32>
    %36 = vector.multi_reduction <add>, %22, %cst_15 [1] : vector<48x32xf32> to vector<48xf32>
    %37 = vector.shape_cast %36 : vector<48xf32> to vector<48x1xf32>
    %cst_16 = arith.constant 3.200000e+01 : f32
    %38 = vector.broadcast %cst_16 : f32 to vector<48x1xf32>
    %39 = arith.divf %37, %38 : vector<48x1xf32>
    %40 = vector.broadcast %39 : vector<48x1xf32> to vector<48x32xf32>
    %41 = arith.subf %22, %40 : vector<48x32xf32>
    %42 = arith.mulf %41, %41 : vector<48x32xf32>
    %cst_17 = arith.constant dense<0.000000e+00> : vector<48xf32>
    %43 = vector.multi_reduction <add>, %42, %cst_17 [1] : vector<48x32xf32> to vector<48xf32>
    %44 = vector.shape_cast %43 : vector<48xf32> to vector<48x1xf32>
    %cst_18 = arith.constant 3.200000e+01 : f32
    %45 = vector.broadcast %cst_18 : f32 to vector<48x1xf32>
    %46 = arith.divf %44, %45 : vector<48x1xf32>
    %47 = vector.broadcast %39 : vector<48x1xf32> to vector<48x32xf32>
    %48 = arith.subf %22, %47 : vector<48x32xf32>
    %cst_19 = arith.constant 9.99999974E-6 : f32
    %49 = vector.broadcast %cst_19 : f32 to vector<48x1xf32>
    %50 = arith.addf %46, %49 : vector<48x1xf32>
    %51 = math.rsqrt %50 : vector<48x1xf32>
    %52 = vector.broadcast %51 : vector<48x1xf32> to vector<48x32xf32>
    %53 = arith.mulf %48, %52 : vector<48x32xf32>
    %54 = vector.broadcast %24 : vector<1x32xf32> to vector<48x32xf32>
    %55 = arith.mulf %53, %54 : vector<48x32xf32>
    %56 = vector.broadcast %25 : vector<1x32xf32> to vector<48x32xf32>
    %57 = arith.addf %55, %56 : vector<48x32xf32>
    %58 = arith.truncf %57 : vector<48x32xf32> to vector<48x32xbf16>
    %cst_20 = arith.constant dense<0.000000e+00> : vector<48x128xf32>
    %59 = tpu.matmul %58, %34, %cst_20 {dimension_numbers = #tpu.dot_dimension_numbers<[1], [0], [0], [1], [0, 0, 1, 1], [], []>} : vector<48x32xbf16>, vector<32x128xbf16>, vector<48x128xf32> -> vector<48x128xf32>
    %60 = vector.broadcast %28 : vector<1x128xf32> to vector<48x128xf32>
    %61 = arith.addf %59, %60 : vector<48x128xf32>
    %62 = vector.extract_strided_slice %61 {offsets = [0, 0], sizes = [48, 32], strides = [1, 1]} : vector<48x128xf32> to vector<48x32xf32>
    %cst_21 = arith.constant 0.353553385 : f32
    %63 = vector.broadcast %cst_21 : f32 to vector<48x32xf32>
    %64 = arith.mulf %62, %63 : vector<48x32xf32>
    %65 = vector.shape_cast %64 : vector<48x32xf32> to vector<2x24x32xf32>
    %66 = vector.extract_strided_slice %61 {offsets = [0, 32], sizes = [48, 32], strides = [1, 1]} : vector<48x128xf32> to vector<48x32xf32>
    %67 = vector.shape_cast %66 : vector<48x32xf32> to vector<2x24x32xf32>
    %68 = vector.extract_strided_slice %61 {offsets = [0, 64], sizes = [48, 32], strides = [1, 1]} : vector<48x128xf32> to vector<48x32xf32>
    %69 = vector.shape_cast %68 : vector<48x32xf32> to vector<2x24x32xf32>
    %70 = vector.shape_cast %65 : vector<2x24x32xf32> to vector<2x1x24x32xf32>
    %71 = vector.shape_cast %67 : vector<2x24x32xf32> to vector<1x2x24x32xf32>
    %72 = vector.broadcast %70 : vector<2x1x24x32xf32> to vector<2x2x24x32xf32>
    %73 = vector.broadcast %71 : vector<1x2x24x32xf32> to vector<2x2x24x32xf32>
    %74 = arith.mulf %72, %73 : vector<2x2x24x32xf32>
    %75 = vector.shape_cast %74 : vector<2x2x24x32xf32> to vector<96x32xf32>
    %76 = arith.truncf %75 : vector<96x32xf32> to vector<96x32xbf16>
    %cst_22 = arith.constant dense<0.000000e+00> : vector<96x32xf32>
    %77 = tpu.matmul %76, %1, %cst_22 {dimension_numbers = #tpu.dot_dimension_numbers<[1], [0], [0], [1], [0, 0, 1, 1], [], []>} : vector<96x32xbf16>, vector<32x32xbf16>, vector<96x32xf32> -> vector<96x32xf32>
    %78 = vector.shape_cast %77 : vector<96x32xf32> to vector<2x2x24x32xf32>
    %cst_23 = arith.constant dense<0xFF800000> : vector<2x24x32xf32>
    %79 = vector.multi_reduction <maximumf>, %78, %cst_23 [1] : vector<2x2x24x32xf32> to vector<2x24x32xf32>
    %80 = vector.shape_cast %79 : vector<2x24x32xf32> to vector<2x1x24x32xf32>
    %81 = vector.broadcast %80 : vector<2x1x24x32xf32> to vector<2x2x24x32xf32>
    %82 = arith.subf %78, %81 : vector<2x2x24x32xf32>
    %83 = math.exp %82 : vector<2x2x24x32xf32>
    %cst_24 = arith.constant dense<0.000000e+00> : vector<2x24x32xf32>
    %84 = vector.multi_reduction <add>, %83, %cst_24 [1] : vector<2x2x24x32xf32> to vector<2x24x32xf32>
    %85 = vector.shape_cast %84 : vector<2x24x32xf32> to vector<2x1x24x32xf32>
    %86 = tpu.reciprocal %85 {approx = true} : vector<2x1x24x32xf32> -> vector<2x1x24x32xf32>
    %87 = vector.broadcast %86 : vector<2x1x24x32xf32> to vector<2x2x24x32xf32>
    %88 = arith.mulf %83, %87 : vector<2x2x24x32xf32>
    %89 = vector.shape_cast %69 : vector<2x24x32xf32> to vector<1x2x24x32xf32>
    %90 = vector.broadcast %89 : vector<1x2x24x32xf32> to vector<2x2x24x32xf32>
    %91 = arith.mulf %88, %90 : vector<2x2x24x32xf32>
    %cst_25 = arith.constant dense<0.000000e+00> : vector<2x24x32xf32>
    %92 = vector.multi_reduction <add>, %91, %cst_25 [1] : vector<2x2x24x32xf32> to vector<2x24x32xf32>
    %93 = vector.shape_cast %92 : vector<2x24x32xf32> to vector<48x32xf32>
    %94 = arith.truncf %93 : vector<48x32xf32> to vector<48x32xbf16>
    %cst_26 = arith.constant dense<0.000000e+00> : vector<48x32xf32>
    %95 = tpu.matmul %94, %32, %cst_26 {dimension_numbers = #tpu.dot_dimension_numbers<[1], [0], [0], [1], [0, 0, 1, 1], [], []>} : vector<48x32xbf16>, vector<32x32xbf16>, vector<48x32xf32> -> vector<48x32xf32>
    %96 = arith.addf %22, %95 : vector<48x32xf32>
    %97 = vector.broadcast %30 : vector<1x32xf32> to vector<48x32xf32>
    %98 = arith.addf %96, %97 : vector<48x32xf32>
    %cst_27 = arith.constant dense<0.000000e+00> : vector<48xf32>
    %99 = vector.multi_reduction <add>, %98, %cst_27 [1] : vector<48x32xf32> to vector<48xf32>
    %100 = vector.shape_cast %99 : vector<48xf32> to vector<48x1xf32>
    %cst_28 = arith.constant 3.200000e+01 : f32
    %101 = vector.broadcast %cst_28 : f32 to vector<48x1xf32>
    %102 = arith.divf %100, %101 : vector<48x1xf32>
    %103 = vector.broadcast %102 : vector<48x1xf32> to vector<48x32xf32>
    %104 = arith.subf %98, %103 : vector<48x32xf32>
    %105 = arith.mulf %104, %104 : vector<48x32xf32>
    %cst_29 = arith.constant dense<0.000000e+00> : vector<48xf32>
    %106 = vector.multi_reduction <add>, %105, %cst_29 [1] : vector<48x32xf32> to vector<48xf32>
    %107 = vector.shape_cast %106 : vector<48xf32> to vector<48x1xf32>
    %cst_30 = arith.constant 3.200000e+01 : f32
    %108 = vector.broadcast %cst_30 : f32 to vector<48x1xf32>
    %109 = arith.divf %107, %108 : vector<48x1xf32>
    %110 = vector.broadcast %102 : vector<48x1xf32> to vector<48x32xf32>
    %111 = arith.subf %98, %110 : vector<48x32xf32>
    %cst_31 = arith.constant 9.99999974E-6 : f32
    %112 = vector.broadcast %cst_31 : f32 to vector<48x1xf32>
    %113 = arith.addf %109, %112 : vector<48x1xf32>
    %114 = math.rsqrt %113 : vector<48x1xf32>
    %115 = vector.broadcast %114 : vector<48x1xf32> to vector<48x32xf32>
    %116 = arith.mulf %111, %115 : vector<48x32xf32>
    %117 = vector.broadcast %26 : vector<1x32xf32> to vector<48x32xf32>
    %118 = arith.mulf %116, %117 : vector<48x32xf32>
    %119 = vector.broadcast %27 : vector<1x32xf32> to vector<48x32xf32>
    %120 = arith.addf %118, %119 : vector<48x32xf32>
    %121 = arith.truncf %120 : vector<48x32xf32> to vector<48x32xbf16>
    %cst_32 = arith.constant dense<0.000000e+00> : vector<48x128xf32>
    %122 = tpu.matmul %121, %35, %cst_32 {dimension_numbers = #tpu.dot_dimension_numbers<[1], [0], [0], [1], [0, 0, 1, 1], [], []>} : vector<48x32xbf16>, vector<32x128xbf16>, vector<48x128xf32> -> vector<48x128xf32>
    %123 = vector.broadcast %29 : vector<1x128xf32> to vector<48x128xf32>
    %124 = arith.addf %122, %123 : vector<48x128xf32>
    %cst_33 = arith.constant 5.000000e-01 : f32
    %125 = vector.broadcast %cst_33 : f32 to vector<48x128xf32>
    %126 = arith.mulf %125, %124 : vector<48x128xf32>
    %cst_34 = arith.constant 4.471500e-02 : f32
    %127 = vector.broadcast %cst_34 : f32 to vector<48x128xf32>
    %128 = arith.mulf %127, %124 : vector<48x128xf32>
    %129 = arith.mulf %128, %124 : vector<48x128xf32>
    %130 = arith.mulf %129, %124 : vector<48x128xf32>
    %131 = arith.addf %124, %130 : vector<48x128xf32>
    %cst_35 = arith.constant 0.797884583 : f32
    %132 = vector.broadcast %cst_35 : f32 to vector<48x128xf32>
    %133 = arith.mulf %132, %131 : vector<48x128xf32>
    %134 = math.tanh %133 : vector<48x128xf32>
    %cst_36 = arith.constant 1.000000e+00 : f32
    %135 = vector.broadcast %cst_36 : f32 to vector<48x128xf32>
    %136 = arith.addf %135, %134 : vector<48x128xf32>
    %137 = arith.mulf %126, %136 : vector<48x128xf32>
    %138 = arith.truncf %137 : vector<48x128xf32> to vector<48x128xbf16>
    %cst_37 = arith.constant dense<0.000000e+00> : vector<48x32xf32>
    %139 = tpu.matmul %138, %33, %cst_37 {dimension_numbers = #tpu.dot_dimension_numbers<[1], [0], [0], [1], [0, 0, 1, 1], [], []>} : vector<48x128xbf16>, vector<128x32xbf16>, vector<48x32xf32> -> vector<48x32xf32>
    %140 = arith.addf %98, %139 : vector<48x32xf32>
    %141 = vector.broadcast %31 : vector<1x32xf32> to vector<48x32xf32>
    %142 = arith.addf %140, %141 : vector<48x32xf32>
    %c40 = arith.constant 40 : index
    %c0_38 = arith.constant 0 : index
    %143 = vector.load %arg3[%c40, %c0_38] : memref<48x128xf32, #tpu.memory_space<vmem>>, vector<8x128xf32>
    %144 = vector.extract_strided_slice %143 {offsets = [0, 0], sizes = [1, 32], strides = [1, 1]} : vector<8x128xf32> to vector<1x32xf32>
    %145 = vector.extract_strided_slice %143 {offsets = [1, 0], sizes = [1, 32], strides = [1, 1]} : vector<8x128xf32> to vector<1x32xf32>
    %146 = vector.extract_strided_slice %143 {offsets = [2, 0], sizes = [1, 32], strides = [1, 1]} : vector<8x128xf32> to vector<1x32xf32>
    %147 = vector.extract_strided_slice %143 {offsets = [3, 0], sizes = [1, 32], strides = [1, 1]} : vector<8x128xf32> to vector<1x32xf32>
    %148 = vector.extract_strided_slice %143 {offsets = [4, 0], sizes = [1, 128], strides = [1, 1]} : vector<8x128xf32> to vector<1x128xf32>
    %149 = vector.extract_strided_slice %143 {offsets = [5, 0], sizes = [1, 128], strides = [1, 1]} : vector<8x128xf32> to vector<1x128xf32>
    %150 = vector.extract_strided_slice %143 {offsets = [6, 0], sizes = [1, 32], strides = [1, 1]} : vector<8x128xf32> to vector<1x32xf32>
    %151 = vector.extract_strided_slice %143 {offsets = [7, 0], sizes = [1, 32], strides = [1, 1]} : vector<8x128xf32> to vector<1x32xf32>
    %c256 = arith.constant 256 : index
    %c0_39 = arith.constant 0 : index
    %152 = vector.load %arg1[%c256, %c0_39] : memref<416x32xbf16, #tpu.memory_space<vmem>>, vector<32x32xbf16>
    %c288 = arith.constant 288 : index
    %c0_40 = arith.constant 0 : index
    %153 = vector.load %arg1[%c288, %c0_40] : memref<416x32xbf16, #tpu.memory_space<vmem>>, vector<128x32xbf16>
    %c64_41 = arith.constant 64 : index
    %c0_42 = arith.constant 0 : index
    %154 = vector.load %arg2[%c64_41, %c0_42] : memref<160x128xbf16, #tpu.memory_space<vmem>>, vector<32x128xbf16>
    %c96_43 = arith.constant 96 : index
    %c0_44 = arith.constant 0 : index
    %155 = vector.load %arg2[%c96_43, %c0_44] : memref<160x128xbf16, #tpu.memory_space<vmem>>, vector<32x128xbf16>
    %cst_45 = arith.constant dense<0.000000e+00> : vector<48xf32>
    %156 = vector.multi_reduction <add>, %142, %cst_45 [1] : vector<48x32xf32> to vector<48xf32>
    %157 = vector.shape_cast %156 : vector<48xf32> to vector<48x1xf32>
    %cst_46 = arith.constant 3.200000e+01 : f32
    %158 = vector.broadcast %cst_46 : f32 to vector<48x1xf32>
    %159 = arith.divf %157, %158 : vector<48x1xf32>
    %160 = vector.broadcast %159 : vector<48x1xf32> to vector<48x32xf32>
    %161 = arith.subf %142, %160 : vector<48x32xf32>
    %162 = arith.mulf %161, %161 : vector<48x32xf32>
    %cst_47 = arith.constant dense<0.000000e+00> : vector<48xf32>
    %163 = vector.multi_reduction <add>, %162, %cst_47 [1] : vector<48x32xf32> to vector<48xf32>
    %164 = vector.shape_cast %163 : vector<48xf32> to vector<48x1xf32>
    %cst_48 = arith.constant 3.200000e+01 : f32
    %165 = vector.broadcast %cst_48 : f32 to vector<48x1xf32>
    %166 = arith.divf %164, %165 : vector<48x1xf32>
    %167 = vector.broadcast %159 : vector<48x1xf32> to vector<48x32xf32>
    %168 = arith.subf %142, %167 : vector<48x32xf32>
    %cst_49 = arith.constant 9.99999974E-6 : f32
    %169 = vector.broadcast %cst_49 : f32 to vector<48x1xf32>
    %170 = arith.addf %166, %169 : vector<48x1xf32>
    %171 = math.rsqrt %170 : vector<48x1xf32>
    %172 = vector.broadcast %171 : vector<48x1xf32> to vector<48x32xf32>
    %173 = arith.mulf %168, %172 : vector<48x32xf32>
    %174 = vector.broadcast %144 : vector<1x32xf32> to vector<48x32xf32>
    %175 = arith.mulf %173, %174 : vector<48x32xf32>
    %176 = vector.broadcast %145 : vector<1x32xf32> to vector<48x32xf32>
    %177 = arith.addf %175, %176 : vector<48x32xf32>
    %178 = arith.truncf %177 : vector<48x32xf32> to vector<48x32xbf16>
    %cst_50 = arith.constant dense<0.000000e+00> : vector<48x128xf32>
    %179 = tpu.matmul %178, %154, %cst_50 {dimension_numbers = #tpu.dot_dimension_numbers<[1], [0], [0], [1], [0, 0, 1, 1], [], []>} : vector<48x32xbf16>, vector<32x128xbf16>, vector<48x128xf32> -> vector<48x128xf32>
    %180 = vector.broadcast %148 : vector<1x128xf32> to vector<48x128xf32>
    %181 = arith.addf %179, %180 : vector<48x128xf32>
    %182 = vector.extract_strided_slice %181 {offsets = [0, 0], sizes = [48, 32], strides = [1, 1]} : vector<48x128xf32> to vector<48x32xf32>
    %cst_51 = arith.constant 0.353553385 : f32
    %183 = vector.broadcast %cst_51 : f32 to vector<48x32xf32>
    %184 = arith.mulf %182, %183 : vector<48x32xf32>
    %185 = vector.shape_cast %184 : vector<48x32xf32> to vector<2x24x32xf32>
    %186 = vector.extract_strided_slice %181 {offsets = [0, 32], sizes = [48, 32], strides = [1, 1]} : vector<48x128xf32> to vector<48x32xf32>
    %187 = vector.shape_cast %186 : vector<48x32xf32> to vector<2x24x32xf32>
    %188 = vector.extract_strided_slice %181 {offsets = [0, 64], sizes = [48, 32], strides = [1, 1]} : vector<48x128xf32> to vector<48x32xf32>
    %189 = vector.shape_cast %188 : vector<48x32xf32> to vector<2x24x32xf32>
    %190 = vector.shape_cast %185 : vector<2x24x32xf32> to vector<2x1x24x32xf32>
    %191 = vector.shape_cast %187 : vector<2x24x32xf32> to vector<1x2x24x32xf32>
    %192 = vector.broadcast %190 : vector<2x1x24x32xf32> to vector<2x2x24x32xf32>
    %193 = vector.broadcast %191 : vector<1x2x24x32xf32> to vector<2x2x24x32xf32>
    %194 = arith.mulf %192, %193 : vector<2x2x24x32xf32>
    %195 = vector.shape_cast %194 : vector<2x2x24x32xf32> to vector<96x32xf32>
    %196 = arith.truncf %195 : vector<96x32xf32> to vector<96x32xbf16>
    %cst_52 = arith.constant dense<0.000000e+00> : vector<96x32xf32>
    %197 = tpu.matmul %196, %1, %cst_52 {dimension_numbers = #tpu.dot_dimension_numbers<[1], [0], [0], [1], [0, 0, 1, 1], [], []>} : vector<96x32xbf16>, vector<32x32xbf16>, vector<96x32xf32> -> vector<96x32xf32>
    %198 = vector.shape_cast %197 : vector<96x32xf32> to vector<2x2x24x32xf32>
    %cst_53 = arith.constant dense<0xFF800000> : vector<2x24x32xf32>
    %199 = vector.multi_reduction <maximumf>, %198, %cst_53 [1] : vector<2x2x24x32xf32> to vector<2x24x32xf32>
    %200 = vector.shape_cast %199 : vector<2x24x32xf32> to vector<2x1x24x32xf32>
    %201 = vector.broadcast %200 : vector<2x1x24x32xf32> to vector<2x2x24x32xf32>
    %202 = arith.subf %198, %201 : vector<2x2x24x32xf32>
    %203 = math.exp %202 : vector<2x2x24x32xf32>
    %cst_54 = arith.constant dense<0.000000e+00> : vector<2x24x32xf32>
    %204 = vector.multi_reduction <add>, %203, %cst_54 [1] : vector<2x2x24x32xf32> to vector<2x24x32xf32>
    %205 = vector.shape_cast %204 : vector<2x24x32xf32> to vector<2x1x24x32xf32>
    %206 = tpu.reciprocal %205 {approx = true} : vector<2x1x24x32xf32> -> vector<2x1x24x32xf32>
    %207 = vector.broadcast %206 : vector<2x1x24x32xf32> to vector<2x2x24x32xf32>
    %208 = arith.mulf %203, %207 : vector<2x2x24x32xf32>
    %209 = vector.shape_cast %189 : vector<2x24x32xf32> to vector<1x2x24x32xf32>
    %210 = vector.broadcast %209 : vector<1x2x24x32xf32> to vector<2x2x24x32xf32>
    %211 = arith.mulf %208, %210 : vector<2x2x24x32xf32>
    %cst_55 = arith.constant dense<0.000000e+00> : vector<2x24x32xf32>
    %212 = vector.multi_reduction <add>, %211, %cst_55 [1] : vector<2x2x24x32xf32> to vector<2x24x32xf32>
    %213 = vector.shape_cast %212 : vector<2x24x32xf32> to vector<48x32xf32>
    %214 = arith.truncf %213 : vector<48x32xf32> to vector<48x32xbf16>
    %cst_56 = arith.constant dense<0.000000e+00> : vector<48x32xf32>
    %215 = tpu.matmul %214, %152, %cst_56 {dimension_numbers = #tpu.dot_dimension_numbers<[1], [0], [0], [1], [0, 0, 1, 1], [], []>} : vector<48x32xbf16>, vector<32x32xbf16>, vector<48x32xf32> -> vector<48x32xf32>
    %216 = arith.addf %142, %215 : vector<48x32xf32>
    %217 = vector.broadcast %150 : vector<1x32xf32> to vector<48x32xf32>
    %218 = arith.addf %216, %217 : vector<48x32xf32>
    %cst_57 = arith.constant dense<0.000000e+00> : vector<48xf32>
    %219 = vector.multi_reduction <add>, %218, %cst_57 [1] : vector<48x32xf32> to vector<48xf32>
    %220 = vector.shape_cast %219 : vector<48xf32> to vector<48x1xf32>
    %cst_58 = arith.constant 3.200000e+01 : f32
    %221 = vector.broadcast %cst_58 : f32 to vector<48x1xf32>
    %222 = arith.divf %220, %221 : vector<48x1xf32>
    %223 = vector.broadcast %222 : vector<48x1xf32> to vector<48x32xf32>
    %224 = arith.subf %218, %223 : vector<48x32xf32>
    %225 = arith.mulf %224, %224 : vector<48x32xf32>
    %cst_59 = arith.constant dense<0.000000e+00> : vector<48xf32>
    %226 = vector.multi_reduction <add>, %225, %cst_59 [1] : vector<48x32xf32> to vector<48xf32>
    %227 = vector.shape_cast %226 : vector<48xf32> to vector<48x1xf32>
    %cst_60 = arith.constant 3.200000e+01 : f32
    %228 = vector.broadcast %cst_60 : f32 to vector<48x1xf32>
    %229 = arith.divf %227, %228 : vector<48x1xf32>
    %230 = vector.broadcast %222 : vector<48x1xf32> to vector<48x32xf32>
    %231 = arith.subf %218, %230 : vector<48x32xf32>
    %cst_61 = arith.constant 9.99999974E-6 : f32
    %232 = vector.broadcast %cst_61 : f32 to vector<48x1xf32>
    %233 = arith.addf %229, %232 : vector<48x1xf32>
    %234 = math.rsqrt %233 : vector<48x1xf32>
    %235 = vector.broadcast %234 : vector<48x1xf32> to vector<48x32xf32>
    %236 = arith.mulf %231, %235 : vector<48x32xf32>
    %237 = vector.broadcast %146 : vector<1x32xf32> to vector<48x32xf32>
    %238 = arith.mulf %236, %237 : vector<48x32xf32>
    %239 = vector.broadcast %147 : vector<1x32xf32> to vector<48x32xf32>
    %240 = arith.addf %238, %239 : vector<48x32xf32>
    %241 = arith.truncf %240 : vector<48x32xf32> to vector<48x32xbf16>
    %cst_62 = arith.constant dense<0.000000e+00> : vector<48x128xf32>
    %242 = tpu.matmul %241, %155, %cst_62 {dimension_numbers = #tpu.dot_dimension_numbers<[1], [0], [0], [1], [0, 0, 1, 1], [], []>} : vector<48x32xbf16>, vector<32x128xbf16>, vector<48x128xf32> -> vector<48x128xf32>
    %243 = vector.broadcast %149 : vector<1x128xf32> to vector<48x128xf32>
    %244 = arith.addf %242, %243 : vector<48x128xf32>
    %cst_63 = arith.constant 5.000000e-01 : f32
    %245 = vector.broadcast %cst_63 : f32 to vector<48x128xf32>
    %246 = arith.mulf %245, %244 : vector<48x128xf32>
    %cst_64 = arith.constant 4.471500e-02 : f32
    %247 = vector.broadcast %cst_64 : f32 to vector<48x128xf32>
    %248 = arith.mulf %247, %244 : vector<48x128xf32>
    %249 = arith.mulf %248, %244 : vector<48x128xf32>
    %250 = arith.mulf %249, %244 : vector<48x128xf32>
    %251 = arith.addf %244, %250 : vector<48x128xf32>
    %cst_65 = arith.constant 0.797884583 : f32
    %252 = vector.broadcast %cst_65 : f32 to vector<48x128xf32>
    %253 = arith.mulf %252, %251 : vector<48x128xf32>
    %254 = math.tanh %253 : vector<48x128xf32>
    %cst_66 = arith.constant 1.000000e+00 : f32
    %255 = vector.broadcast %cst_66 : f32 to vector<48x128xf32>
    %256 = arith.addf %255, %254 : vector<48x128xf32>
    %257 = arith.mulf %246, %256 : vector<48x128xf32>
    %258 = arith.truncf %257 : vector<48x128xf32> to vector<48x128xbf16>
    %cst_67 = arith.constant dense<0.000000e+00> : vector<48x32xf32>
    %259 = tpu.matmul %258, %153, %cst_67 {dimension_numbers = #tpu.dot_dimension_numbers<[1], [0], [0], [1], [0, 0, 1, 1], [], []>} : vector<48x128xbf16>, vector<128x32xbf16>, vector<48x32xf32> -> vector<48x32xf32>
    %260 = arith.addf %218, %259 : vector<48x32xf32>
    %261 = vector.broadcast %151 : vector<1x32xf32> to vector<48x32xf32>
    %262 = arith.addf %260, %261 : vector<48x32xf32>
    %263 = vector.shape_cast %262 : vector<48x32xf32> to vector<2x24x32xf32>
    %264 = vector.extract_strided_slice %263 {offsets = [0, 0, 0], sizes = [2, 1, 32], strides = [1, 1, 1]} : vector<2x24x32xf32> to vector<2x1x32xf32>
    %265 = vector.shape_cast %264 : vector<2x1x32xf32> to vector<2x32xf32>
    %cst_68 = arith.constant dense<0.000000e+00> : vector<2xf32>
    %266 = vector.multi_reduction <add>, %265, %cst_68 [1] : vector<2x32xf32> to vector<2xf32>
    %267 = vector.shape_cast %266 : vector<2xf32> to vector<2x1xf32>
    %cst_69 = arith.constant 3.200000e+01 : f32
    %268 = vector.broadcast %cst_69 : f32 to vector<2x1xf32>
    %269 = arith.divf %267, %268 : vector<2x1xf32>
    %270 = vector.broadcast %269 : vector<2x1xf32> to vector<2x32xf32>
    %271 = arith.subf %265, %270 : vector<2x32xf32>
    %272 = arith.mulf %271, %271 : vector<2x32xf32>
    %cst_70 = arith.constant dense<0.000000e+00> : vector<2xf32>
    %273 = vector.multi_reduction <add>, %272, %cst_70 [1] : vector<2x32xf32> to vector<2xf32>
    %274 = vector.shape_cast %273 : vector<2xf32> to vector<2x1xf32>
    %cst_71 = arith.constant 3.200000e+01 : f32
    %275 = vector.broadcast %cst_71 : f32 to vector<2x1xf32>
    %276 = arith.divf %274, %275 : vector<2x1xf32>
    %277 = vector.broadcast %269 : vector<2x1xf32> to vector<2x32xf32>
    %278 = arith.subf %265, %277 : vector<2x32xf32>
    %cst_72 = arith.constant 9.99999974E-6 : f32
    %279 = vector.broadcast %cst_72 : f32 to vector<2x1xf32>
    %280 = arith.addf %276, %279 : vector<2x1xf32>
    %281 = math.rsqrt %280 : vector<2x1xf32>
    %282 = vector.broadcast %281 : vector<2x1xf32> to vector<2x32xf32>
    %283 = arith.mulf %278, %282 : vector<2x32xf32>
    %284 = vector.broadcast %6 : vector<1x32xf32> to vector<2x32xf32>
    %285 = arith.mulf %283, %284 : vector<2x32xf32>
    %286 = vector.broadcast %7 : vector<1x32xf32> to vector<2x32xf32>
    %287 = arith.addf %285, %286 : vector<2x32xf32>
    %c128_73 = arith.constant 128 : index
    %c0_74 = arith.constant 0 : index
    %288 = vector.load %arg2[%c128_73, %c0_74] : memref<160x128xbf16, #tpu.memory_space<vmem>>, vector<32x128xbf16>
    %289 = arith.truncf %287 : vector<2x32xf32> to vector<2x32xbf16>
    %cst_75 = arith.constant dense<0.000000e+00> : vector<2x128xf32>
    %290 = tpu.matmul %289, %288, %cst_75 {dimension_numbers = #tpu.dot_dimension_numbers<[1], [0], [0], [1], [0, 0, 1, 1], [], []>} : vector<2x32xbf16>, vector<32x128xbf16>, vector<2x128xf32> -> vector<2x128xf32>
    %291 = vector.broadcast %8 : vector<1x128xf32> to vector<2x128xf32>
    %292 = arith.addf %290, %291 : vector<2x128xf32>
    %c0_76 = arith.constant 0 : index
    %c0_77 = arith.constant 0 : index
    %293 = vector.load %arg4[%c0_76, %c0_77] : memref<2x128xf32, #tpu.memory_space<vmem>>, vector<2x128xf32>
    tpu.vector_store %arg4[%c0_76, %c0_77], %292 {strides = array<i32>} : memref<2x128xf32, #tpu.memory_space<vmem>>, vector<2x128xf32>,
    return
  }
}

</mosaic_0001>

<bundles_post_ra>
// kernel: vit_forward.1
= control target key start
LH: loop header
LB: loop body
LE: loop exit
PB: predicated region body
PF: predicated region fallthrough
CT: control target
= control target key end

     0   :  { %vm158_vm0 = vcmask 261120   ;;  %vm69_vm1 = vcmask 523264   ;;  %s3423_s0 = inlined_call_operand.vmem [shape: f32[32,64], index: 0, kind: input, shape index: {}]   ;;  %s3424_s1 = inlined_call_operand.vmem [shape: bf16[416,32], index: 1, kind: input, shape index: {}]   ;;  %s3425_s2 = inlined_call_operand.vmem [shape: bf16[160,128], index: 2, kind: input, shape index: {}]   ;;  %s3426_s3 = inlined_call_operand.vmem [shape: f32[48,128], index: 3, kind: input, shape index: {}]   ;;  %s3427_s4 = inlined_call_operand.hbm [shape: f32[2,128], index: 4, kind: output, shape index: {}]  }
   0x1   :  { %v2516_v0 = vld [vmem:[%s3424_s1] sm:$0xff]   ;;  %v2517_v1 = vld [vmem:[%s3424_s1 + $0x8] sm:$0xff]   ;;  %v2518_v2 = vld [vmem:[%s3424_s1 + $0x10] sm:$0xff]  }
   0x2   :  { %2307 = vmatprep.subr.bf16.mxu0 %v2516_v0  ;;  %v35_v3 = vld [vmem:[%s3423_s0] sm:$0xff]  ;;  %v36_v4 = vld [vmem:[%s3423_s0 + $0x8] sm:$0xff]  ;;  %v2771_v6 = vld [vmem:[%s3426_s3 + $0x10] sm:$0xff] }
   0x3   :  { %2308 = vmatpush3.bf16.msra.mxu0 %v2516_v0  ;;  %v39_v5 = vpack.c.bf16 %v36_v4, %v35_v3  ;;  %v2519_v7 = vld [vmem:[%s3424_s1 + $0x18] sm:$0xff]   ;;  %v159_v8 = vsel %vm158_vm0, %v2771_v6, 0.0  ;;  %v37_v9 = vld [vmem:[%s3423_s0 + $0x10] sm:$0xff] }
   0x4   :  { %2309 = vmatprep.subr.bf16.mxu0 %v2517_v1  ;;  %160 = vadd.xlane.f32.xlu0 %v159_v8  ;;  %v38_v10 = vld [vmem:[%s3423_s0 + $0x18] sm:$0xff] }
   0x5   :  { %2315 = vmatprep.mubr.msk.bf16.mxu0 %vm69_vm1, %v39_v5  ;;  %v40_v11 = vpack.c.bf16 %v38_v10, %v37_v9 }
   0x7   :  { %2310 = vmatpush3.bf16.msra.mxu0 %v2517_v1 }
   0x8   :  { %2311 = vmatprep.subr.bf16.mxu0 %v2518_v2 }
   0xb   :  { %2312 = vmatpush3.bf16.msra.mxu0 %v2518_v2 }
   0xc   :  { %2313 = vmatprep.subr.bf16.mxu0 %v2519_v7 }
   0xf   :  { %2314 = vmatpush3.bf16.msra.mxu0 %v2519_v7 }
  0x12   :  { %2316 = vmatmul.mubr.msk.bf16.vlgmr.msra.gmra.mrb[0].mxu0 %vm69_vm1, %v40_v11 }
  0x13   :  { %9 = vsyncpa [#allocation3], 0  ;;  %v41_v12 = vlaneseq  ;;  %v34_v15 = vld [vmem:[%s3426_s3 + $0x18] sm:$0xff]  ;;  %v31_v19 = vld [vmem:[%s3426_s3] sm:$0xff]  ;;  %v2723_v61 = vmov 0.0   ;;  %vm2724_vm2 = vmmov 0  }
  0x14   :  { %v32_v24 = vld [vmem:[%s3426_s3 + $0x8] sm:$0xff]  ;;  %v2520_v60 = vld [vmem:[%s3425_s2] sm:$0xff]   ;;  %2319 = vmatprep.subr.bf16.mxu1 %v2723_v61  ;;  %2323 = vmatprep.mubr.msk.bf16.mxu1 %vm2724_vm2, %v2723_v61  ;;  %s2725_s22 = smov 96   ;;  %s2726_s23 = smov 64   ;;  %vm2029_vm3 = vcmask 1041409   ;;  %vm2032_vm4 = vcmask 254976  }
  0x15   :  { %v2784_v13 = vshrl.u32 %v41_v12, 7  ;;  %2320 = vmatpush3.bf16.msra.mxu1 %v2520_v60  ;;  %v2521_v62 = vld [vmem:[%s3425_s2 + $0x8] sm:$0xff]  }
  0x16   :  { %2321 = vmatprep.subr.bf16.mxu1 %v2723_v61 }
  0x17   :  { %v2787_v14 = vsub.s32 0, %v2784_v13 }
  0x19   :  { %v44_v16 = vrot.slane %v34_v15, %v2787_v14  ;;  %2322 = vmatpush3.bf16.msra.mxu1 %v2521_v62 }
  0x1a   :  { %2351 = vmatprep.subr.bf16.mxu1 %v2723_v61 }
  0x91   :  { %v161_v17 = vpop.xlane.xlu0 %160 }
  0x92   :  { %v175_v23 = vmul.f32 0.03125, %v161_v17 }
  0x94   :  { %v2808_v33 = vsub.f32 %v2771_v6, %v175_v23 }
  0x96   :  { %v185_v37 = vmul.f32 %v2808_v33, %v2808_v33 }
  0x98   :  { %v190_v39 = vsel %vm158_vm0, %v185_v37, 0.0 }
  0xe5   :  { %v2317_v18 = vpop.f32.mrb[0].mxu0 }
  0xe6   :  { %v110_v20 = vpop.f32.mrb[1].mxu0  ;;  %v119_v27 = vadd.f32 %v2317_v18, %v44_v16 }
  0xe7   :  { %v111_v21 = vadd.f32 %v110_v20, %v44_v16  ;;  %v2318_v22 = vpop.f32.mrb[2].mxu0 }
  0xe8   :  { %v122_v25 = vadd.f32 %v2318_v22, %v44_v16  ;;  %v113_v26 = vpop.f32.mrb[3].mxu0  ;;  %v2810_v34 = vadd.f32 %v119_v27, %v31_v19 }
  0xe9   :  { %v2799_v28 = vadd.f32 %v111_v21, %v31_v19  ;;  %v114_v29 = vadd.f32 %v113_v26, %v44_v16  ;;  %v2847_v16 = vld [vmem:[%s3426_s3 + $0x20] sm:$0xff]  ;;  %v2853_v21 = vsub.s32 1, %v2784_v13 }
  0xea   :  { %v2801_v30 = vadd.f32 %v122_v25, %v32_v24  ;;  %v168_v38 = vsel %vm158_vm0, %v2810_v34, 0.0  ;;  %v228_v19 = vrot.slane %v2847_v16, %v2787_v14 }
  0xeb   :  { %v2803_v31 = vadd.f32 %v114_v29, %v32_v24  ;;  %v162_v32 = vsel %vm158_vm0, %v2799_v28, 0.0  ;;  %v237_v25 = vrot.slane %v2847_v16, %v2853_v21 }
  0xec   :  { %163 = vadd.xlane.f32.xlu0 %v162_v32  ;;  %v171_v36 = vsel %vm158_vm0, %v2801_v30, 0.0 }
  0xed   :  { %v165_v35 = vsel %vm158_vm0, %v2803_v31, 0.0 }
  0xee   :  { %166 = vadd.xlane.f32.xlu1 %v165_v35 }
  0xf0   :  { %172 = vadd.xlane.f32.xlu0 %v171_v36 }
  0xf2   :  { %169 = vadd.xlane.f32.xlu1 %v168_v38 }
  0xf6   :  { %191 = vadd.xlane.f32.xlu1 %v190_v39 }
 0x179   :  { %v164_v40 = vpop.xlane.xlu0 %163 }
 0x17a   :  { %v176_v41 = vmul.f32 0.03125, %v164_v40 }
 0x17b   :  { %v167_v42 = vpop.xlane.xlu1 %166 }
 0x17c   :  { %v181_v43 = vsub.f32 %v2799_v28, %v176_v41  ;;  %v177_v44 = vmul.f32 0.03125, %v167_v42 }
 0x17d   :  { %v173_v45 = vpop.xlane.xlu0 %172 }
 0x17e   :  { %v182_v46 = vsub.f32 %v2803_v31, %v177_v44  ;;  %v179_v47 = vmul.f32 0.03125, %v173_v45  ;;  %v186_v48 = vmul.f32 %v181_v43, %v181_v43 }
 0x17f   :  { %v170_v49 = vpop.xlane.xlu1 %169 }
 0x180   :  { %v2824_v50 = vsub.f32 %v2801_v30, %v179_v47  ;;  %v178_v51 = vmul.f32 0.03125, %v170_v49  ;;  %v193_v52 = vsel %vm158_vm0, %v186_v48, 0.0  ;;  %v187_v53 = vmul.f32 %v182_v46, %v182_v46  ;;  %v2871_v49 = vld [vmem:[%s3424_s1 + $0x20] sm:$0xff]  }
 0x181   :  { %194 = vadd.xlane.f32.xlu0 %v193_v52  ;;  %v248_v48 = vsub.s32 4, %v2784_v13  ;;  %2335 = vmatprep.subr.bf16.mxu0 %v2871_v49 }
 0x182   :  { %v183_v54 = vsub.f32 %v2810_v34, %v178_v51  ;;  %v196_v55 = vsel %vm158_vm0, %v187_v53, 0.0  ;;  %v189_v56 = vmul.f32 %v2824_v50, %v2824_v50  ;;  %v2880_v51 = vld [vmem:[%s3424_s1 + $0x28] sm:$0xff]   ;;  %2336 = vmatpush3.bf16.msra.mxu0 %v2871_v49 }
 0x183   :  { %197 = vadd.xlane.f32.xlu1 %v196_v55  ;;  %v192_v63 = vpop.xlane.xlu1 %191  ;;  %2337 = vmatprep.subr.bf16.mxu0 %v2880_v51 }
 0x184   :  { %v188_v57 = vmul.f32 %v183_v54, %v183_v54  ;;  %v202_v59 = vsel %vm158_vm0, %v189_v56, 0.0  ;;  %v205_v0 = vmul.f32 0.03125, %v192_v63 }
 0x186   :  { %v199_v58 = vsel %vm158_vm0, %v188_v57, 0.0  ;;  %v210_v1 = vadd.f32 1e-05, %v205_v0  ;;  %2338 = vmatpush3.bf16.msra.mxu0 %v2880_v51 }
 0x187   :  { %200 = vadd.xlane.f32.xlu0 %v199_v58  ;;  %203 = vadd.xlane.f32.xlu1 %v202_v59 }
 0x188   :  { %2552 = vrsqrt.f32 %v210_v1  ;;  %2367 = vmatprep.subr.bf16.mxu0 %v2723_v61 }
 0x192   :  { %v2553_v15 = vpop.eup %2552 }
 0x193   :  { %v220_v20 = vmul.f32 %v2553_v15, %v2808_v33 }
 0x195   :  { %v229_v24 = vmul.f32 %v228_v19, %v220_v20 }
 0x197   :  { %v238_v32 = vadd.f32 %v237_v25, %v229_v24 }
 0x20e   :  { %v195_v2 = vpop.xlane.xlu0 %194 }
 0x20f   :  { %v206_v3 = vmul.f32 0.03125, %v195_v2 }
 0x210   :  { %v198_v4 = vpop.xlane.xlu1 %197 }
 0x211   :  { %v211_v5 = vadd.f32 1e-05, %v206_v3  ;;  %v207_v7 = vmul.f32 0.03125, %v198_v4 }
 0x213   :  { %2554 = vrsqrt.f32 %v211_v5  ;;  %v212_v8 = vadd.f32 1e-05, %v207_v7 }
 0x214   :  { %v204_v9 = vpop.xlane.xlu1 %203  ;;  %v201_v10 = vpop.xlane.xlu0 %200 }
 0x215   :  { %2556 = vrsqrt.f32 %v212_v8  ;;  %v209_v11 = vmul.f32 0.03125, %v204_v9  ;;  %v208_v12 = vmul.f32 0.03125, %v201_v10 }
 0x217   :  { %v214_v17 = vadd.f32 1e-05, %v209_v11  ;;  %v213_v18 = vadd.f32 1e-05, %v208_v12 }
 0x219   :  { %2558 = vrsqrt.f32 %v214_v17 }
 0x21a   :  { %2560 = vrsqrt.f32 %v213_v18 }
 0x21d   :  { %v2555_v22 = vpop.eup %2554 }
 0x21e   :  { %v221_v23 = vmul.f32 %v2555_v22, %v181_v43 }
 0x21f   :  { %v2557_v26 = vpop.eup %2556 }
 0x220   :  { %v222_v27 = vmul.f32 %v2557_v26, %v182_v46  ;;  %v230_v29 = vmul.f32 %v228_v19, %v221_v23 }
 0x222   :  { %v239_v35 = vadd.f32 %v237_v25, %v230_v29  ;;  %v231_v38 = vmul.f32 %v228_v19, %v222_v27 }
 0x223   :  { %v2559_v36 = vpop.eup %2558 }
 0x224   :  { %v243_v37 = vpack.c.bf16 %v239_v35, %v238_v32  ;;  %v2561_v33 = vpop.eup %2560  ;;  %v224_v39 = vmul.f32 %v2559_v36, %v2824_v50  ;;  %v240_v41 = vadd.f32 %v237_v25, %v231_v38  ;;  %v249_v50 = vrot.slane %v2847_v16, %v248_v48 }
 0x225   :  { %v223_v40 = vmul.f32 %v2561_v33, %v183_v54 }
 0x226   :  { %2324 = vmatmul.mubr.msk.bf16.vlgmr.msra.gmra.mrb[0].mxu1 %vm158_vm0, %v243_v37  ;;  %v244_v42 = vpack.c.bf16 %v238_v32, %v240_v41  ;;  %v233_v44 = vmul.f32 %v228_v19, %v224_v39 }
 0x227   :  { %2327 = vmatprep.mubr.msk.bf16.mxu1 %vm2724_vm2, %v2723_v61  ;;  %v232_v43 = vmul.f32 %v228_v19, %v223_v40 }
 0x228   :  { %v242_v46 = vadd.f32 %v237_v25, %v233_v44 }
 0x229   :  { %v241_v45 = vadd.f32 %v237_v25, %v232_v43 }
 0x22b   :  { %v245_v47 = vpack.c.bf16 %v242_v46, %v241_v45  ;;  %v2524_v46 = vld [vmem:[%s3424_s1 + $0x30] sm:$0xff]  }
 0x22c   :  { %2352 = vmatpush3.bf16.msra.mxu1 %v2524_v46 }
 0x22d   :  { %2353 = vmatprep.subr.bf16.mxu1 %v2723_v61 }
 0x22e   :  { %2328 = vmatmul.mubr.msk.bf16.gmra.mrb[4].mxu1 %vm158_vm0, %v244_v42 }
 0x22f   :  { %2331 = vmatprep.mubr.msk.bf16.mxu1 %vm2724_vm2, %v2723_v61 }
 0x236   :  { %2332 = vmatmul.mubr.msk.bf16.gmra.mrb[8].mxu1 %vm158_vm0, %v245_v47  ;;  %v2525_v47 = vld [vmem:[%s3424_s1 + $0x38] sm:$0xff]  }
 0x237   :  { %2355 = vmatprep.mubr.msk.bf16.mxu1 %vm2724_vm2, %v2723_v61  ;;  %2354 = vmatpush3.bf16.msra.mxu1 %v2525_v47 }
 0x238   :  { %2383 = vmatprep.subr.bf16.mxu1 %v2723_v61 }
 0x2f9   :  { %v305_v52 = vpop.f32.mrb[0].mxu1 }
 0x2fa   :  { %v306_v53 = vadd.f32 %v305_v52, %v249_v50  ;;  %v2325_v54 = vpop.f32.mrb[1].mxu1 }
 0x2fb   :  { %v308_v55 = vpop.f32.mrb[2].mxu1 }
 0x2fc   :  { %v309_v56 = vadd.f32 %v308_v55, %v249_v50  ;;  %340 = vrot.lane.b32.xlu0 %v306_v53, %s2725_s22  ;;  %v2326_v57 = vpop.f32.mrb[3].mxu1  ;;  %v328_v8 = vmul.f32 0.35355338, %v306_v53 }
 0x2fe   :  { %342 = vrot.lane.b32.xlu1 %v309_v56, %s2725_s22  ;;  %v329_v11 = vmul.f32 0.35355338, %v309_v56 }
 0x301   :  { %v313_v58 = vpop.f32.mrb[4].mxu1 }
 0x302   :  { %v314_v59 = vadd.f32 %v313_v58, %v249_v50  ;;  %v2329_v60 = vpop.f32.mrb[5].mxu1 }
 0x303   :  { %v316_v62 = vpop.f32.mrb[6].mxu1 }
 0x304   :  { %344 = vrot.lane.b32.xlu1 %v314_v59, %s2725_s22  ;;  %v2330_v63 = vpop.f32.mrb[7].mxu1  ;;  %v317_v0 = vadd.f32 %v316_v62, %v249_v50  ;;  %v330_v25 = vmul.f32 0.35355338, %v314_v59 }
 0x306   :  { %v331_v10 = vmul.f32 0.35355338, %v317_v0 }
 0x308   :  { %346 = vrot.lane.b32.xlu1 %v317_v0, %s2725_s22 }
 0x309   :  { %v321_v1 = vpop.f32.mrb[8].mxu1 }
 0x30a   :  { %v322_v2 = vadd.f32 %v321_v1, %v249_v50  ;;  %v2333_v3 = vpop.f32.mrb[9].mxu1 }
 0x30b   :  { %v324_v4 = vpop.f32.mrb[10].mxu1 }
 0x30c   :  { %v325_v5 = vadd.f32 %v324_v4, %v249_v50  ;;  %348 = vrot.lane.b32.xlu0 %v322_v2, %s2725_s22  ;;  %v2334_v7 = vpop.f32.mrb[11].mxu1  ;;  %v332_v12 = vmul.f32 0.35355338, %v322_v2 }
 0x30e   :  { %350 = vrot.lane.b32.xlu1 %v325_v5, %s2725_s22  ;;  %v333_v26 = vmul.f32 0.35355338, %v325_v5 }
 0x310   :  { %577 = vrot.lane.b32.xlu0 %v306_v53, %s2726_s23 }
 0x312   :  { %579 = vrot.lane.b32.xlu1 %v309_v56, %s2726_s23 }
 0x314   :  { %583 = vrot.lane.b32.xlu0 %v317_v0, %s2726_s23 }
 0x316   :  { %585 = vrot.lane.b32.xlu1 %v322_v2, %s2726_s23 }
 0x318   :  { %581 = vrot.lane.b32.xlu0 %v314_v59, %s2726_s23 }
 0x31a   :  { %587 = vrot.lane.b32.xlu1 %v325_v5, %s2726_s23 }
 0x36e   :  { %v341_v9 = vpop.permute.xlu0 %340 }
 0x36f   :  { %v358_v17 = vmul.f32 %v341_v9, %v328_v8  ;;  %v364_v18 = vmul.f32 %v341_v9, %v331_v10 }
 0x370   :  { %v343_v15 = vpop.permute.xlu1 %342 }
 0x371   :  { %v359_v19 = vmul.f32 %v343_v15, %v329_v11  ;;  %v365_v20 = vmul.f32 %v343_v15, %v332_v12 }
 0x373   :  { %v370_v22 = vpack.c.bf16 %v359_v19, %v358_v17  ;;  %v373_v23 = vpack.c.bf16 %v365_v20, %v364_v18 }
 0x375   :  { %2339 = vmatprep.mubr.msk.bf16.mxu0 %vm158_vm0, %v370_v22 }
 0x376   :  { %v345_v24 = vpop.permute.xlu1 %344 }
 0x377   :  { %v360_v29 = vmul.f32 %v345_v24, %v330_v25  ;;  %v366_v32 = vmul.f32 %v345_v24, %v333_v26 }
 0x37a   :  { %v347_v27 = vpop.permute.xlu1 %346 }
 0x37b   :  { %v361_v35 = vmul.f32 %v347_v27, %v328_v8  ;;  %v367_v36 = vmul.f32 %v347_v27, %v331_v10 }
 0x37d   :  { %v371_v37 = vpack.c.bf16 %v361_v35, %v360_v29  ;;  %v374_v38 = vpack.c.bf16 %v367_v36, %v366_v32 }
 0x37e   :  { %v349_v33 = vpop.permute.xlu0 %348 }
 0x37f   :  { %2340 = vmatmul.mubr.msk.bf16.vlgmr.msra.gmra.mrb[4].mxu0 %vm158_vm0, %v371_v37  ;;  %v362_v40 = vmul.f32 %v349_v33, %v329_v11  ;;  %v368_v41 = vmul.f32 %v349_v33, %v332_v12 }
 0x380   :  { %v351_v39 = vpop.permute.xlu1 %350 }
 0x381   :  { %v363_v42 = vmul.f32 %v351_v39, %v330_v25  ;;  %v369_v43 = vmul.f32 %v351_v39, %v333_v26 }
 0x383   :  { %v372_v44 = vpack.c.bf16 %v363_v42, %v362_v40  ;;  %v375_v45 = vpack.c.bf16 %v369_v43, %v368_v41 }
 0x385   :  { %2343 = vmatprep.mubr.msk.bf16.mxu0 %vm158_vm0, %v372_v44 }
 0x387   :  { %2344 = vmatmul.mubr.msk.bf16.gmra.mrb[8].mxu0 %vm158_vm0, %v373_v23 }
 0x388   :  { %2347 = vmatprep.mubr.msk.bf16.mxu0 %vm158_vm0, %v374_v38 }
 0x38f   :  { %2348 = vmatmul.mubr.msk.bf16.gmra.mrb[12].mxu0 %vm158_vm0, %v375_v45 }
 0x390   :  { %2371 = vmatprep.mubr.msk.bf16.mxu0 %vm2724_vm2, %v2723_v61 }
 0x452   :  { %v2341_v50 = vpop.f32.mrb[4].mxu0 }
 0x453   :  { %v440_v52 = vpop.f32.mrb[5].mxu0  ;;  %v493_v7 = vsel %vm158_vm0, %v2341_v50, -inf }
 0x454   :  { %v487_v53 = vsel %vm158_vm0, %v440_v52, -inf  ;;  %v2342_v54 = vpop.f32.mrb[6].mxu0 }
 0x455   :  { %v488_v55 = vsel %vm158_vm0, %v2342_v54, -inf  ;;  %v443_v56 = vpop.f32.mrb[7].mxu0 }
 0x456   :  { %v489_v57 = vmax.f32 %v487_v53, %v488_v55  ;;  %v490_v1 = vsel %vm158_vm0, %v443_v56, -inf }
 0x458   :  { %v505_v58 = vsub.f32 %v440_v52, %v489_v57  ;;  %v508_v59 = vsub.f32 %v2342_v54, %v489_v57 }
 0x45a   :  { %v517_v60 = vmul.f32 1.442695, %v505_v58  ;;  %v523_v62 = vmul.f32 1.442695, %v508_v59  ;;  %v2345_v63 = vpop.f32.mrb[8].mxu0 }
 0x45b   :  { %v456_v0 = vpop.f32.mrb[9].mxu0  ;;  %v496_v41 = vsel %vm158_vm0, %v2345_v63, -inf }
 0x45c   :  { %2562 = vpow2.f32 %v517_v60  ;;  %v491_v2 = vsel %vm158_vm0, %v456_v0, -inf  ;;  %v2346_v3 = vpop.f32.mrb[10].mxu0 }
 0x45d   :  { %2564 = vpow2.f32 %v523_v62  ;;  %v492_v4 = vmax.f32 %v490_v1, %v491_v2  ;;  %v459_v5 = vpop.f32.mrb[11].mxu0  ;;  %v499_v19 = vsel %vm158_vm0, %v2346_v3, -inf }
 0x45e   :  { %v494_v8 = vsel %vm158_vm0, %v459_v5, -inf }
 0x45f   :  { %v506_v9 = vsub.f32 %v443_v56, %v492_v4  ;;  %v509_v10 = vsub.f32 %v456_v0, %v492_v4  ;;  %v495_v11 = vmax.f32 %v493_v7, %v494_v8 }
 0x461   :  { %v519_v12 = vmul.f32 1.442695, %v506_v9  ;;  %v525_v15 = vmul.f32 1.442695, %v509_v10  ;;  %v507_v17 = vsub.f32 %v2341_v50, %v495_v11  ;;  %v510_v18 = vsub.f32 %v459_v5, %v495_v11  ;;  %v580_v9 = vpop.permute.xlu1 %579 }
 0x462   :  { %v2349_v20 = vpop.f32.mrb[12].mxu0 }
 0x463   :  { %2566 = vpow2.f32 %v519_v12  ;;  %v521_v22 = vmul.f32 1.442695, %v507_v17  ;;  %v527_v23 = vmul.f32 1.442695, %v510_v18  ;;  %v500_v24 = vsel %vm158_vm0, %v2349_v20, -inf  ;;  %v472_v25 = vpop.f32.mrb[13].mxu0 }
 0x464   :  { %2568 = vpow2.f32 %v525_v15  ;;  %v501_v26 = vmax.f32 %v499_v19, %v500_v24  ;;  %v502_v27 = vsel %vm158_vm0, %v472_v25, -inf  ;;  %v2350_v29 = vpop.f32.mrb[14].mxu0 }
 0x465   :  { %2570 = vpow2.f32 %v521_v22  ;;  %v503_v32 = vsel %vm158_vm0, %v2350_v29, -inf  ;;  %v475_v35 = vpop.f32.mrb[15].mxu0 }
 0x466   :  { %v2563_v36 = vpop.eup %2562  ;;  %2572 = vpow2.f32 %v527_v23  ;;  %v512_v37 = vsub.f32 %v2346_v3, %v501_v26  ;;  %v515_v38 = vsub.f32 %v2349_v20, %v501_v26  ;;  %v504_v33 = vmax.f32 %v502_v27, %v503_v32 }
 0x467   :  { %v2565_v39 = vpop.eup %2564  ;;  %v541_v40 = vsel %vm158_vm0, %v2563_v36, 0.0  ;;  %v497_v42 = vsel %vm158_vm0, %v475_v35, -inf }
 0x468   :  { %v542_v43 = vsel %vm158_vm0, %v2565_v39, 0.0  ;;  %v531_v44 = vmul.f32 1.442695, %v512_v37  ;;  %v537_v45 = vmul.f32 1.442695, %v515_v38  ;;  %v513_v46 = vsub.f32 %v472_v25, %v504_v33 }
 0x469   :  { %v543_v47 = vadd.f32 %v542_v43, %v541_v40  ;;  %v516_v50 = vsub.f32 %v2350_v29, %v504_v33  ;;  %v498_v52 = vmax.f32 %v496_v41, %v497_v42 }
 0x46a   :  { %2574 = vpow2.f32 %v531_v44  ;;  %v533_v53 = vmul.f32 1.442695, %v513_v46 }
 0x46b   :  { %2576 = vrcp.f32 %v543_v47  ;;  %v539_v54 = vmul.f32 1.442695, %v516_v50  ;;  %v511_v55 = vsub.f32 %v2345_v63, %v498_v52  ;;  %v514_v56 = vsub.f32 %v475_v35, %v498_v52  ;;  %v2931_v63 = vpop.permute.xlu0 %577  ;;  %v586_v35 = vpop.permute.xlu1 %585 }
 0x46c   :  { %2578 = vpow2.f32 %v537_v45 }
 0x46d   :  { %v2567_v57 = vpop.eup %2566  ;;  %2580 = vpow2.f32 %v533_v53  ;;  %v529_v58 = vmul.f32 1.442695, %v511_v55  ;;  %v535_v59 = vmul.f32 1.442695, %v514_v56 }
 0x46e   :  { %v2569_v60 = vpop.eup %2568  ;;  %v544_v62 = vsel %vm158_vm0, %v2567_v57, 0.0  ;;  %2582 = vpow2.f32 %v539_v54 }
 0x46f   :  { %v2571_v0 = vpop.eup %2570  ;;  %v545_v1 = vsel %vm158_vm0, %v2569_v60, 0.0  ;;  %2584 = vpow2.f32 %v529_v58  ;;  %v584_v19 = vpop.permute.xlu0 %583 }
 0x470   :  { %v2573_v2 = vpop.eup %2572  ;;  %v546_v3 = vadd.f32 %v545_v1, %v544_v62  ;;  %v547_v4 = vsel %vm158_vm0, %v2571_v0, 0.0  ;;  %2586 = vpow2.f32 %v535_v59  ;;  %v588_v54 = vpop.permute.xlu1 %587 }
 0x471   :  { %v548_v5 = vsel %vm158_vm0, %v2573_v2, 0.0 }
 0x472   :  { %2588 = vrcp.f32 %v546_v3  ;;  %v549_v7 = vadd.f32 %v548_v5, %v547_v4 }
 0x473   :  { %v582_v53 = vpop.permute.xlu0 %581 }
 0x474   :  { %v2575_v8 = vpop.eup %2574  ;;  %2590 = vrcp.f32 %v549_v7 }
 0x475   :  { %v2577_v10 = vpop.eup %2576  ;;  %v553_v11 = vsel %vm158_vm0, %v2575_v8, 0.0 }
 0x476   :  { %v2579_v12 = vpop.eup %2578  ;;  %v565_v15 = vmul.f32 %v2577_v10, %v2563_v36  ;;  %v568_v17 = vmul.f32 %v2577_v10, %v2565_v39 }
 0x477   :  { %v2581_v18 = vpop.eup %2580  ;;  %v554_v20 = vsel %vm158_vm0, %v2579_v12, 0.0 }
 0x478   :  { %v2583_v22 = vpop.eup %2582  ;;  %v595_v23 = vmul.f32 %v2931_v63, %v565_v15  ;;  %v598_v24 = vmul.f32 %v584_v19, %v568_v17  ;;  %v555_v25 = vadd.f32 %v554_v20, %v553_v11  ;;  %v556_v26 = vsel %vm158_vm0, %v2581_v18, 0.0 }
 0x479   :  { %v2585_v27 = vpop.eup %2584  ;;  %v557_v29 = vsel %vm158_vm0, %v2583_v22, 0.0 }
 0x47a   :  { %v2587_v32 = vpop.eup %2586  ;;  %v607_v37 = vsel %vm158_vm0, %v595_v23, 0.0  ;;  %v608_v36 = vsel %vm158_vm0, %v598_v24, 0.0  ;;  %2592 = vrcp.f32 %v555_v25  ;;  %v558_v38 = vadd.f32 %v557_v29, %v556_v26 }
 0x47b   :  { %v609_v33 = vadd.f32 %v608_v36, %v607_v37  ;;  %v550_v39 = vsel %vm158_vm0, %v2585_v27, 0.0  ;;  %v551_v40 = vsel %vm158_vm0, %v2587_v32, 0.0 }
 0x47c   :  { %v2589_v41 = vpop.eup %2588  ;;  %2594 = vrcp.f32 %v558_v38  ;;  %v552_v42 = vadd.f32 %v551_v40, %v550_v39 }
 0x47d   :  { %v566_v43 = vmul.f32 %v2589_v41, %v2567_v57  ;;  %v569_v44 = vmul.f32 %v2589_v41, %v2569_v60 }
 0x47e   :  { %v2591_v45 = vpop.eup %2590  ;;  %2596 = vrcp.f32 %v552_v42 }
 0x47f   :  { %v596_v46 = vmul.f32 %v580_v9, %v566_v43  ;;  %v599_v47 = vmul.f32 %v586_v35, %v569_v44  ;;  %v570_v50 = vmul.f32 %v2591_v45, %v2573_v2  ;;  %v567_v52 = vmul.f32 %v2591_v45, %v2571_v0 }
 0x481   :  { %v610_v55 = vsel %vm158_vm0, %v596_v46, 0.0  ;;  %v611_v56 = vsel %vm158_vm0, %v599_v47, 0.0  ;;  %v597_v58 = vmul.f32 %v582_v53, %v567_v52  ;;  %v600_v59 = vmul.f32 %v588_v54, %v570_v50 }
 0x482   :  { %v612_v62 = vadd.f32 %v611_v56, %v610_v55 }
 0x483   :  { %v613_v1 = vsel %vm158_vm0, %v597_v58, 0.0  ;;  %v614_v57 = vsel %vm158_vm0, %v600_v59, 0.0 }
 0x484   :  { %v2593_v60 = vpop.eup %2592  ;;  %v625_v3 = vpack.c.bf16 %v612_v62, %v609_v33  ;;  %v615_v4 = vadd.f32 %v614_v57, %v613_v1 }
 0x485   :  { %v575_v5 = vmul.f32 %v2593_v60, %v2579_v12  ;;  %v572_v7 = vmul.f32 %v2593_v60, %v2575_v8 }
 0x486   :  { %v2595_v2 = vpop.eup %2594  ;;  %2356 = vmatmul.mubr.msk.bf16.vlgmr.msra.gmra.mrb[12].mxu1 %vm158_vm0, %v625_v3 }
 0x487   :  { %v576_v0 = vmul.f32 %v2595_v2, %v2583_v22  ;;  %2359 = vmatprep.mubr.msk.bf16.mxu1 %vm2724_vm2, %v2723_v61  ;;  %v573_v10 = vmul.f32 %v2595_v2, %v2581_v18  ;;  %v602_v11 = vmul.f32 %v580_v9, %v572_v7  ;;  %v605_v15 = vmul.f32 %v586_v35, %v575_v5 }
 0x488   :  { %v2597_v17 = vpop.eup %2596 }
 0x489   :  { %v574_v20 = vmul.f32 %v2597_v17, %v2587_v32  ;;  %v571_v23 = vmul.f32 %v2597_v17, %v2585_v27  ;;  %v603_v24 = vmul.f32 %v582_v53, %v573_v10  ;;  %v606_v25 = vmul.f32 %v588_v54, %v576_v0 }
 0x48a   :  { %v619_v26 = vsel %vm158_vm0, %v602_v11, 0.0  ;;  %v620_v12 = vsel %vm158_vm0, %v605_v15, 0.0 }
 0x48b   :  { %v601_v8 = vmul.f32 %v2931_v63, %v571_v23  ;;  %v604_v29 = vmul.f32 %v584_v19, %v574_v20  ;;  %v621_v37 = vadd.f32 %v620_v12, %v619_v26  ;;  %v622_v22 = vsel %vm158_vm0, %v603_v24, 0.0 }
 0x48c   :  { %v623_v36 = vsel %vm158_vm0, %v606_v25, 0.0  ;;  %v714_v63 = vsub.s32 6, %v2784_v13 }
 0x48d   :  { %v616_v9 = vsel %vm158_vm0, %v601_v8, 0.0  ;;  %v617_v18 = vsel %vm158_vm0, %v604_v29, 0.0  ;;  %v624_v32 = vadd.f32 %v623_v36, %v622_v22 }
 0x48e   :  { %v618_v27 = vadd.f32 %v617_v18, %v616_v9  ;;  %v715_v19 = vrot.slane %v2847_v16, %v714_v63 }
 0x48f   :  { %v627_v35 = vpack.c.bf16 %v624_v32, %v621_v37 }
 0x490   :  { %v626_v38 = vpack.c.bf16 %v618_v27, %v615_v4 }
 0x492   :  { %2360 = vmatmul.mubr.msk.bf16.gmra.mrb[16].mxu1 %vm158_vm0, %v626_v38 }
 0x493   :  { %2363 = vmatprep.mubr.msk.bf16.mxu1 %vm2724_vm2, %v2723_v61 }
 0x49a   :  { %2364 = vmatmul.mubr.msk.bf16.gmra.mrb[20].mxu1 %vm158_vm0, %v627_v35 }
 0x49b   :  { %2399 = vmatprep.mubr.msk.bf16.mxu1 %vm2724_vm2, %v2723_v61 }
 0x559   :  { %v683_v33 = vpop.f32.mrb[12].mxu1 }
 0x55a   :  { %v706_v39 = vadd.f32 %v683_v33, %v2771_v6  ;;  %v2357_v40 = vpop.f32.mrb[13].mxu1 }
 0x55b   :  { %v686_v41 = vpop.f32.mrb[14].mxu1 }
 0x55c   :  { %v2968_v42 = vadd.f32 %v715_v19, %v706_v39  ;;  %v707_v43 = vadd.f32 %v686_v41, %v2799_v28  ;;  %v2358_v44 = vpop.f32.mrb[15].mxu1 }
 0x55d   :  { %v2526_v44 = vld [vmem:[%s3425_s2 + $0x10] sm:$0xff]  }
 0x55e   :  { %v2971_v45 = vadd.f32 %v715_v19, %v707_v43  ;;  %v722_v46 = vsel %vm158_vm0, %v2968_v42, 0.0  ;;  %2368 = vmatpush3.bf16.msra.mxu0 %v2526_v44 }
 0x55f   :  { %723 = vadd.xlane.f32.xlu0 %v722_v46  ;;  %2369 = vmatprep.subr.bf16.mxu0 %v2723_v61  ;;  %v2527_v46 = vld [vmem:[%s3425_s2 + $0x18] sm:$0xff]  }
 0x560   :  { %v725_v47 = vsel %vm158_vm0, %v2971_v45, 0.0 }
 0x561   :  { %726 = vadd.xlane.f32.xlu1 %v725_v47 }
 0x562   :  { %2370 = vmatpush3.bf16.msra.mxu0 %v2527_v46 }
 0x563   :  { %2411 = vmatprep.subr.bf16.mxu0 %v2723_v61 }
 0x565   :  { %v691_v50 = vpop.f32.mrb[16].mxu1 }
 0x566   :  { %v708_v52 = vadd.f32 %v691_v50, %v2803_v31  ;;  %v2361_v53 = vpop.f32.mrb[17].mxu1 }
 0x567   :  { %v694_v54 = vpop.f32.mrb[18].mxu1 }
 0x568   :  { %v2978_v55 = vadd.f32 %v715_v19, %v708_v52  ;;  %v709_v28 = vadd.f32 %v694_v54, %v2771_v6  ;;  %v2362_v56 = vpop.f32.mrb[19].mxu1 }
 0x569   :  { %v3034_v56 = vsub.s32 2, %v2784_v13 }
 0x56a   :  { %v2981_v58 = vadd.f32 %v715_v19, %v709_v28  ;;  %v728_v59 = vsel %vm158_vm0, %v2978_v55, 0.0 }
 0x56b   :  { %729 = vadd.xlane.f32.xlu0 %v728_v59 }
 0x56c   :  { %v731_v31 = vsel %vm158_vm0, %v2981_v58, 0.0 }
 0x56d   :  { %v699_v62 = vpop.f32.mrb[20].mxu1 }
 0x56e   :  { %v710_v1 = vadd.f32 %v699_v62, %v2810_v34  ;;  %v2365_v57 = vpop.f32.mrb[21].mxu1 }
 0x56f   :  { %732 = vadd.xlane.f32.xlu0 %v731_v31  ;;  %v702_v60 = vpop.f32.mrb[22].mxu1  ;;  %v3039_v57 = vsub.s32 3, %v2784_v13 }
 0x570   :  { %v2988_v3 = vadd.f32 %v715_v19, %v710_v1  ;;  %v711_v6 = vadd.f32 %v702_v60, %v2801_v30  ;;  %v2366_v4 = vpop.f32.mrb[23].mxu1  ;;  %v803_v1 = vrot.slane %v2847_v16, %v3034_v56 }
 0x572   :  { %v2991_v5 = vadd.f32 %v715_v19, %v711_v6  ;;  %v734_v7 = vsel %vm158_vm0, %v2988_v3, 0.0 }
 0x573   :  { %735 = vadd.xlane.f32.xlu0 %v734_v7 }
 0x574   :  { %v737_v34 = vsel %vm158_vm0, %v2991_v5, 0.0 }
 0x575   :  { %738 = vadd.xlane.f32.xlu1 %v737_v34 }
 0x5ec   :  { %v724_v2 = vpop.xlane.xlu0 %723 }
 0x5ed   :  { %v740_v0 = vmul.f32 0.03125, %v724_v2  ;;  %v813_v2 = vrot.slane %v2847_v16, %v3039_v57 }
 0x5ee   :  { %v727_v10 = vpop.xlane.xlu1 %726 }
 0x5ef   :  { %v746_v11 = vsub.f32 %v2968_v42, %v740_v0  ;;  %v741_v15 = vmul.f32 0.03125, %v727_v10 }
 0x5f1   :  { %v747_v17 = vsub.f32 %v2971_v45, %v741_v15  ;;  %v752_v30 = vmul.f32 %v746_v11, %v746_v11 }
 0x5f3   :  { %v758_v20 = vsel %vm158_vm0, %v752_v30, 0.0  ;;  %v753_v23 = vmul.f32 %v747_v17, %v747_v17 }
 0x5f4   :  { %759 = vadd.xlane.f32.xlu0 %v758_v20 }
 0x5f5   :  { %v761_v24 = vsel %vm158_vm0, %v753_v23, 0.0 }
 0x5f6   :  { %762 = vadd.xlane.f32.xlu1 %v761_v24 }
 0x5f8   :  { %v730_v25 = vpop.xlane.xlu0 %729 }
 0x5f9   :  { %v742_v26 = vmul.f32 0.03125, %v730_v25 }
 0x5fb   :  { %v3002_v12 = vsub.f32 %v2978_v55, %v742_v26 }
 0x5fc   :  { %v733_v8 = vpop.xlane.xlu0 %732 }
 0x5fd   :  { %v743_v29 = vmul.f32 0.03125, %v733_v8  ;;  %v754_v37 = vmul.f32 %v3002_v12, %v3002_v12 }
 0x5ff   :  { %v3007_v22 = vsub.f32 %v2981_v58, %v743_v29  ;;  %v764_v36 = vsel %vm158_vm0, %v754_v37, 0.0 }
 0x600   :  { %765 = vadd.xlane.f32.xlu0 %v764_v36  ;;  %v736_v9 = vpop.xlane.xlu0 %735 }
 0x601   :  { %v744_v18 = vmul.f32 0.03125, %v736_v9  ;;  %v755_v32 = vmul.f32 %v3007_v22, %v3007_v22 }
 0x602   :  { %v739_v27 = vpop.xlane.xlu1 %738 }
 0x603   :  { %v3013_v35 = vsub.f32 %v2988_v3, %v744_v18  ;;  %v745_v38 = vmul.f32 0.03125, %v739_v27  ;;  %v767_v19 = vsel %vm158_vm0, %v755_v32, 0.0 }
 0x604   :  { %768 = vadd.xlane.f32.xlu1 %v767_v19 }
 0x605   :  { %v3017_v33 = vsub.f32 %v2991_v5, %v745_v38  ;;  %v756_v39 = vmul.f32 %v3013_v35, %v3013_v35 }
 0x607   :  { %v770_v40 = vsel %vm158_vm0, %v756_v39, 0.0  ;;  %v757_v41 = vmul.f32 %v3017_v33, %v3017_v33 }
 0x608   :  { %771 = vadd.xlane.f32.xlu0 %v770_v40 }
 0x609   :  { %v773_v43 = vsel %vm158_vm0, %v757_v41, 0.0 }
 0x60a   :  { %774 = vadd.xlane.f32.xlu1 %v773_v43 }
 0x681   :  { %v760_v47 = vpop.xlane.xlu0 %759 }
 0x682   :  { %v776_v50 = vmul.f32 0.03125, %v760_v47 }
 0x683   :  { %v763_v52 = vpop.xlane.xlu1 %762 }
 0x684   :  { %v782_v53 = vadd.f32 1e-05, %v776_v50  ;;  %v777_v54 = vmul.f32 0.03125, %v763_v52  ;;  %v2530_v52 = vld [vmem:[%s3424_s1 + $0x50] sm:$0xff]  }
 0x686   :  { %2598 = vrsqrt.f32 %v782_v53  ;;  %v783_v28 = vadd.f32 1e-05, %v777_v54  ;;  %v2531_v53 = vld [vmem:[%s3424_s1 + $0x58] sm:$0xff]   ;;  %v2532_v54 = vld [vmem:[%s3424_s1 + $0x60] sm:$0xff]  }
 0x688   :  { %2600 = vrsqrt.f32 %v783_v28  ;;  %v2533_v28 = vld [vmem:[%s3424_s1 + $0x68] sm:$0xff]  }
 0x68d   :  { %v766_v59 = vpop.xlane.xlu0 %765 }
 0x68e   :  { %v778_v62 = vmul.f32 0.03125, %v766_v59  ;;  %v2534_v59 = vld [vmem:[%s3424_s1 + $0x70] sm:$0xff]  }
 0x690   :  { %v2599_v31 = vpop.eup %2598  ;;  %v784_v60 = vadd.f32 1e-05, %v778_v62  ;;  %v2535_v62 = vld [vmem:[%s3424_s1 + $0x78] sm:$0xff]  }
 0x691   :  { %v794_v6 = vmul.f32 %v2599_v31, %v746_v11  ;;  %v769_v4 = vpop.xlane.xlu1 %768 }
 0x692   :  { %v2601_v7 = vpop.eup %2600  ;;  %2602 = vrsqrt.f32 %v784_v60  ;;  %v779_v34 = vmul.f32 0.03125, %v769_v4 }
 0x693   :  { %v804_v0 = vmul.f32 %v803_v1, %v794_v6  ;;  %v795_v10 = vmul.f32 %v2601_v7, %v747_v17 }
 0x694   :  { %v785_v15 = vadd.f32 1e-05, %v779_v34 }
 0x695   :  { %v805_v30 = vmul.f32 %v803_v1, %v795_v10  ;;  %v772_v20 = vpop.xlane.xlu0 %771  ;;  %v814_v24 = vadd.f32 %v813_v2, %v804_v0 }
 0x696   :  { %2604 = vrsqrt.f32 %v785_v15  ;;  %v780_v23 = vmul.f32 0.03125, %v772_v20 }
 0x697   :  { %v815_v25 = vadd.f32 %v813_v2, %v805_v30  ;;  %v775_v26 = vpop.xlane.xlu1 %774 }
 0x698   :  { %v786_v8 = vadd.f32 1e-05, %v780_v23  ;;  %v781_v29 = vmul.f32 0.03125, %v775_v26 }
 0x699   :  { %v820_v11 = vpack.c.bf16 %v815_v25, %v814_v24 }
 0x69a   :  { %2606 = vrsqrt.f32 %v786_v8  ;;  %v787_v37 = vadd.f32 1e-05, %v781_v29 }
 0x69b   :  { %2372 = vmatmul.mubr.msk.bf16.vlgmr.msra.gmra.mrb[16].mxu0 %vm158_vm0, %v820_v11 }
 0x69c   :  { %v2603_v36 = vpop.eup %2602  ;;  %2608 = vrsqrt.f32 %v787_v37  ;;  %2375 = vmatprep.mubr.msk.bf16.mxu0 %vm2724_vm2, %v2723_v61 }
 0x69d   :  { %v796_v17 = vmul.f32 %v2603_v36, %v3002_v12 }
 0x69f   :  { %v806_v32 = vmul.f32 %v803_v1, %v796_v17 }
 0x6a0   :  { %v2605_v9 = vpop.eup %2604 }
 0x6a1   :  { %v797_v18 = vmul.f32 %v2605_v9, %v3007_v22  ;;  %v816_v39 = vadd.f32 %v813_v2, %v806_v32 }
 0x6a3   :  { %v807_v27 = vmul.f32 %v803_v1, %v797_v18 }
 0x6a4   :  { %v2607_v38 = vpop.eup %2606 }
 0x6a5   :  { %v798_v19 = vmul.f32 %v2607_v38, %v3013_v35  ;;  %v817_v40 = vadd.f32 %v813_v2, %v807_v27  ;;  %v2528_v35 = vld [vmem:[%s3424_s1 + $0x40] sm:$0xff]  }
 0x6a6   :  { %v2609_v41 = vpop.eup %2608  ;;  %2384 = vmatpush3.bf16.msra.mxu1 %v2528_v35 }
 0x6a7   :  { %v799_v43 = vmul.f32 %v2609_v41, %v3017_v33  ;;  %v821_v44 = vpack.c.bf16 %v817_v40, %v816_v39  ;;  %v808_v46 = vmul.f32 %v803_v1, %v798_v19  ;;  %2385 = vmatprep.subr.bf16.mxu1 %v2723_v61  ;;  %v2529_v33 = vld [vmem:[%s3424_s1 + $0x48] sm:$0xff]  }
 0x6a9   :  { %2376 = vmatmul.mubr.msk.bf16.gmra.mrb[20].mxu0 %vm158_vm0, %v821_v44  ;;  %v809_v47 = vmul.f32 %v803_v1, %v799_v43  ;;  %v818_v22 = vadd.f32 %v813_v2, %v808_v46  ;;  %v825_v1 = vsub.s32 5, %v2784_v13 }
 0x6aa   :  { %2379 = vmatprep.mubr.msk.bf16.mxu0 %vm2724_vm2, %v2723_v61  ;;  %2386 = vmatpush3.bf16.msra.mxu1 %v2529_v33 }
 0x6ab   :  { %v819_v12 = vadd.f32 %v813_v2, %v809_v47  ;;  %2387 = vmatprep.subr.bf16.mxu1 %v2723_v61  ;;  %v826_v31 = vrot.slane %v2847_v16, %v825_v1 }
 0x6ad   :  { %v822_v50 = vpack.c.bf16 %v819_v12, %v818_v22 }
 0x6ae   :  { %2388 = vmatpush3.bf16.msra.mxu1 %v2530_v52 }
 0x6af   :  { %2389 = vmatprep.subr.bf16.mxu1 %v2723_v61 }
 0x6b1   :  { %2380 = vmatmul.mubr.msk.bf16.gmra.mrb[24].mxu0 %vm158_vm0, %v822_v50 }
 0x6b2   :  { %2415 = vmatprep.mubr.msk.bf16.mxu0 %vm2724_vm2, %v2723_v61  ;;  %2390 = vmatpush3.bf16.msra.mxu1 %v2531_v53 }
 0x6b3   :  { %2391 = vmatprep.subr.bf16.mxu1 %v2723_v61 }
 0x6b6   :  { %2392 = vmatpush3.bf16.msra.mxu1 %v2532_v54 }
 0x6b7   :  { %2393 = vmatprep.subr.bf16.mxu1 %v2723_v61 }
 0x6ba   :  { %2394 = vmatpush3.bf16.msra.mxu1 %v2533_v28 }
 0x6bb   :  { %2395 = vmatprep.subr.bf16.mxu1 %v2723_v61 }
 0x6be   :  { %2396 = vmatpush3.bf16.msra.mxu1 %v2534_v59 }
 0x6bf   :  { %2397 = vmatprep.subr.bf16.mxu1 %v2723_v61 }
 0x6c2   :  { %2398 = vmatpush3.bf16.msra.mxu1 %v2535_v62 }
 0x6c3   :  { %2427 = vmatprep.subr.bf16.mxu1 %v2871_v49 }
 0x76e   :  { %v882_v60 = vpop.f32.mrb[16].mxu0 }
 0x76f   :  { %v883_v6 = vadd.f32 %v882_v60, %v826_v31  ;;  %v2373_v4 = vpop.f32.mrb[17].mxu0 }
 0x770   :  { %v885_v7 = vpop.f32.mrb[18].mxu0 }
 0x771   :  { %v911_v34 = vmul.f32 0.044715, %v883_v6  ;;  %v886_v2 = vadd.f32 %v885_v7, %v826_v31  ;;  %v2374_v0 = vpop.f32.mrb[19].mxu0  ;;  %v905_v53 = vmul.f32 0.5, %v883_v6 }
 0x773   :  { %v917_v10 = vmul.f32 %v911_v34, %v883_v6  ;;  %v912_v15 = vmul.f32 0.044715, %v886_v2  ;;  %v906_v54 = vmul.f32 0.5, %v886_v2 }
 0x775   :  { %v923_v30 = vmul.f32 %v917_v10, %v883_v6  ;;  %v918_v20 = vmul.f32 %v912_v15, %v886_v2 }
 0x777   :  { %v929_v23 = vadd.f32 %v923_v30, %v883_v6  ;;  %v924_v24 = vmul.f32 %v918_v20, %v886_v2 }
 0x779   :  { %v935_v25 = vmul.f32 0.7978846, %v929_v23  ;;  %v930_v26 = vadd.f32 %v924_v24, %v886_v2 }
 0x77b   :  { %2610 = vtanh.f32 %v935_v25  ;;  %v936_v8 = vmul.f32 0.7978846, %v930_v26 }
 0x77c   :  { %v890_v29 = vpop.f32.mrb[20].mxu0 }
 0x77d   :  { %2612 = vtanh.f32 %v936_v8  ;;  %v891_v16 = vadd.f32 %v890_v29, %v826_v31  ;;  %v2377_v11 = vpop.f32.mrb[21].mxu0 }
 0x77e   :  { %v893_v37 = vpop.f32.mrb[22].mxu0 }
 0x77f   :  { %v913_v36 = vmul.f32 0.044715, %v891_v16  ;;  %v894_v17 = vadd.f32 %v893_v37, %v826_v31  ;;  %v2378_v9 = vpop.f32.mrb[23].mxu0  ;;  %v907_v25 = vmul.f32 0.5, %v891_v16 }
 0x781   :  { %v919_v18 = vmul.f32 %v913_v36, %v891_v16  ;;  %v914_v32 = vmul.f32 0.044715, %v894_v17  ;;  %v908_v26 = vmul.f32 0.5, %v894_v17 }
 0x783   :  { %v925_v27 = vmul.f32 %v919_v18, %v891_v16  ;;  %v920_v38 = vmul.f32 %v914_v32, %v894_v17 }
 0x784   :  { %v898_v19 = vpop.f32.mrb[24].mxu0 }
 0x785   :  { %v2611_v39 = vpop.eup %2610  ;;  %v926_v40 = vmul.f32 %v920_v38, %v894_v17  ;;  %v899_v41 = vadd.f32 %v898_v19, %v826_v31  ;;  %v2381_v43 = vpop.f32.mrb[25].mxu0  ;;  %v931_v44 = vadd.f32 %v925_v27, %v891_v16  ;;  %v1075_v16 = vsub.s32 7, %v2784_v13 }
 0x786   :  { %v901_v46 = vpop.f32.mrb[26].mxu0  ;;  %v947_v47 = vadd.f32 1.0, %v2611_v39 }
 0x787   :  { %v2613_v12 = vpop.eup %2612  ;;  %v915_v22 = vmul.f32 0.044715, %v899_v41  ;;  %v902_v50 = vadd.f32 %v901_v46, %v826_v31  ;;  %v2382_v35 = vpop.f32.mrb[27].mxu0  ;;  %v932_v33 = vadd.f32 %v926_v40, %v894_v17  ;;  %v937_v52 = vmul.f32 0.7978846, %v931_v44  ;;  %v2696_v17 = vld [vmem:[%s3426_s3 + $0x20] sm:$0xff] }
 0x788   :  { %v948_v28 = vadd.f32 1.0, %v2613_v12  ;;  %v953_v4 = vmul.f32 %v947_v47, %v905_v53  ;;  %v909_v18 = vmul.f32 0.5, %v899_v41  ;;  %v1076_v39 = vrot.slane %v2696_v17, %v1075_v16 }
 0x789   :  { %v921_v59 = vmul.f32 %v915_v22, %v899_v41  ;;  %v916_v62 = vmul.f32 0.044715, %v902_v50  ;;  %v938_v60 = vmul.f32 0.7978846, %v932_v33  ;;  %2614 = vtanh.f32 %v937_v52 }
 0x78a   :  { %v954_v7 = vmul.f32 %v948_v28, %v906_v54  ;;  %v910_v32 = vmul.f32 0.5, %v902_v50 }
 0x78b   :  { %v927_v34 = vmul.f32 %v921_v59, %v899_v41  ;;  %v922_v0 = vmul.f32 %v916_v62, %v902_v50  ;;  %2616 = vtanh.f32 %v938_v60 }
 0x78c   :  { %v959_v10 = vpack.c.bf16 %v954_v7, %v953_v4 }
 0x78d   :  { %v928_v15 = vmul.f32 %v922_v0, %v902_v50  ;;  %v933_v30 = vadd.f32 %v927_v34, %v899_v41 }
 0x78e   :  { %2400 = vmatmul.mubr.bf16.vlgmr.msra.gmra.mrb[24].mxu1 %v959_v10 }
 0x78f   :  { %2403 = vmatprep.mubr.msk.bf16.mxu1 %vm2724_vm2, %v2723_v61  ;;  %v934_v31 = vadd.f32 %v928_v15, %v902_v50  ;;  %v939_v6 = vmul.f32 0.7978846, %v933_v30  ;;  %2428 = vmatpush3.bf16.msra.mxu1 %v2871_v49 }
 0x790   :  { %2429 = vmatprep.subr.bf16.mxu1 %v2880_v51 }
 0x791   :  { %v940_v2 = vmul.f32 0.7978846, %v934_v31  ;;  %2618 = vtanh.f32 %v939_v6 }
 0x793   :  { %v2615_v20 = vpop.eup %2614  ;;  %2620 = vtanh.f32 %v940_v2  ;;  %2430 = vmatpush3.bf16.msra.mxu1 %v2880_v51 }
 0x794   :  { %v949_v23 = vadd.f32 1.0, %v2615_v20  ;;  %2459 = vmatprep.subr.bf16.mxu1 %v2723_v61 }
 0x795   :  { %v2617_v24 = vpop.eup %2616 }
 0x796   :  { %v950_v8 = vadd.f32 1.0, %v2617_v24  ;;  %v955_v29 = vmul.f32 %v949_v23, %v907_v25 }
 0x798   :  { %v956_v11 = vmul.f32 %v950_v8, %v908_v26 }
 0x79a   :  { %v960_v37 = vpack.c.bf16 %v956_v11, %v955_v29 }
 0x79b   :  { %v2619_v36 = vpop.eup %2618 }
 0x79c   :  { %2404 = vmatmul.mubr.bf16.gmra.mrb[28].mxu1 %v960_v37  ;;  %v951_v49 = vadd.f32 1.0, %v2619_v36 }
 0x79d   :  { %v2621_v9 = vpop.eup %2620  ;;  %2407 = vmatprep.mubr.msk.bf16.mxu1 %vm2724_vm2, %v2723_v61 }
 0x79e   :  { %v952_v51 = vadd.f32 1.0, %v2621_v9  ;;  %v957_v27 = vmul.f32 %v951_v49, %v909_v18 }
 0x7a0   :  { %v958_v38 = vmul.f32 %v952_v51, %v910_v32 }
 0x7a2   :  { %v961_v19 = vpack.c.bf16 %v958_v38, %v957_v27 }
 0x7a4   :  { %2408 = vmatmul.mubr.bf16.gmra.mrb[32].mxu1 %v961_v19 }
 0x861   :  { %v1044_v40 = vpop.f32.mrb[24].mxu1 }
 0x862   :  { %v1067_v43 = vadd.f32 %v1044_v40, %v2968_v42  ;;  %v2401_v44 = vpop.f32.mrb[25].mxu1 }
 0x863   :  { %v1047_v41 = vpop.f32.mrb[26].mxu1 }
 0x864   :  { %v3107_v46 = vadd.f32 %v1076_v39, %v1067_v43  ;;  %v1068_v47 = vadd.f32 %v1047_v41, %v2971_v45  ;;  %v2402_v12 = vpop.f32.mrb[27].mxu1 }
 0x866   :  { %v3110_v22 = vadd.f32 %v1076_v39, %v1068_v47  ;;  %v1112_v50 = vsel %vm158_vm0, %v3107_v46, 0.0 }
 0x867   :  { %1113 = vadd.xlane.f32.xlu0 %v1112_v50  ;;  %v2536_v50 = vld [vmem:[%s3425_s2 + $0x20] sm:$0xff]  }
 0x868   :  { %v1115_v35 = vsel %vm158_vm0, %v3110_v22, 0.0  ;;  %2412 = vmatpush3.bf16.msra.mxu0 %v2536_v50 }
 0x869   :  { %1116 = vadd.xlane.f32.xlu1 %v1115_v35  ;;  %2413 = vmatprep.subr.bf16.mxu0 %v2723_v61  ;;  %v2537_v35 = vld [vmem:[%s3425_s2 + $0x28] sm:$0xff]  }
 0x86c   :  { %2414 = vmatpush3.bf16.msra.mxu0 %v2537_v35 }
 0x86d   :  { %2443 = vmatprep.subr.bf16.mxu0 %v2723_v61 }
 0x86f   :  { %v1052_v33 = vpop.f32.mrb[28].mxu1 }
 0x870   :  { %v1069_v42 = vadd.f32 %v1052_v33, %v2978_v55  ;;  %v2405_v52 = vpop.f32.mrb[29].mxu1 }
 0x871   :  { %v1055_v53 = vpop.f32.mrb[30].mxu1 }
 0x872   :  { %v3117_v54 = vadd.f32 %v1076_v39, %v1069_v42  ;;  %v1070_v45 = vadd.f32 %v1055_v53, %v2981_v58  ;;  %v2406_v28 = vpop.f32.mrb[31].mxu1 }
 0x874   :  { %v3120_v59 = vadd.f32 %v1076_v39, %v1070_v45  ;;  %v1118_v62 = vsel %vm158_vm0, %v3117_v54, 0.0 }
 0x875   :  { %1119 = vadd.xlane.f32.xlu0 %v1118_v62  ;;  %v3171_v62 = vld [vmem:[%s3426_s3 + $0x28] sm:$0xff] }
 0x876   :  { %v1121_v60 = vsel %vm158_vm0, %v3120_v59, 0.0 }
 0x877   :  { %1122 = vadd.xlane.f32.xlu1 %v1121_v60  ;;  %v1060_v4 = vpop.f32.mrb[32].mxu1  ;;  %v1193_v60 = vrot.slane %v3171_v62, %v2787_v14 }
 0x878   :  { %v1071_v55 = vadd.f32 %v1060_v4, %v2988_v3  ;;  %v2409_v7 = vpop.f32.mrb[33].mxu1 }
 0x879   :  { %v1063_v34 = vpop.f32.mrb[34].mxu1 }
 0x87a   :  { %v3127_v0 = vadd.f32 %v1076_v39, %v1071_v55  ;;  %v1072_v58 = vadd.f32 %v1063_v34, %v2991_v5  ;;  %v2410_v10 = vpop.f32.mrb[35].mxu1 }
 0x87c   :  { %v3130_v15 = vadd.f32 %v1076_v39, %v1072_v58  ;;  %v1124_v30 = vsel %vm158_vm0, %v3127_v0, 0.0 }
 0x87d   :  { %1125 = vadd.xlane.f32.xlu0 %v1124_v30 }
 0x87e   :  { %v1127_v31 = vsel %vm158_vm0, %v3130_v15, 0.0 }
 0x87f   :  { %1128 = vadd.xlane.f32.xlu1 %v1127_v31 }
 0x8f4   :  { %v1114_v6 = vpop.xlane.xlu0 %1113 }
 0x8f5   :  { %v1130_v2 = vmul.f32 0.03125, %v1114_v6  ;;  %v1203_v6 = vrot.slane %v3171_v62, %v2853_v21 }
 0x8f6   :  { %v1117_v3 = vpop.xlane.xlu1 %1116 }
 0x8f7   :  { %v1136_v20 = vsub.f32 %v3107_v46, %v1130_v2  ;;  %v1131_v23 = vmul.f32 0.03125, %v1117_v3 }
 0x8f9   :  { %v1137_v24 = vsub.f32 %v3110_v22, %v1131_v23  ;;  %v1142_v5 = vmul.f32 %v1136_v20, %v1136_v20 }
 0x8fb   :  { %v1148_v25 = vsel %vm158_vm0, %v1142_v5, 0.0  ;;  %v1143_v26 = vmul.f32 %v1137_v24, %v1137_v24 }
 0x8fc   :  { %1149 = vadd.xlane.f32.xlu0 %v1148_v25 }
 0x8fd   :  { %v1151_v8 = vsel %vm158_vm0, %v1143_v26, 0.0 }
 0x8fe   :  { %1152 = vadd.xlane.f32.xlu1 %v1151_v8 }
 0x902   :  { %v1120_v29 = vpop.xlane.xlu0 %1119 }
 0x903   :  { %v1132_v11 = vmul.f32 0.03125, %v1120_v29 }
 0x904   :  { %v1123_v37 = vpop.xlane.xlu1 %1122 }
 0x905   :  { %v3141_v36 = vsub.f32 %v3117_v54, %v1132_v11  ;;  %v1133_v49 = vmul.f32 0.03125, %v1123_v37 }
 0x907   :  { %v3144_v9 = vsub.f32 %v3120_v59, %v1133_v49  ;;  %v1144_v18 = vmul.f32 %v3141_v36, %v3141_v36 }
 0x909   :  { %v1154_v32 = vsel %vm158_vm0, %v1144_v18, 0.0  ;;  %v1145_v51 = vmul.f32 %v3144_v9, %v3144_v9 }
 0x90a   :  { %1155 = vadd.xlane.f32.xlu0 %v1154_v32  ;;  %v1126_v27 = vpop.xlane.xlu0 %1125 }
 0x90b   :  { %v1134_v38 = vmul.f32 0.03125, %v1126_v27  ;;  %v1157_v19 = vsel %vm158_vm0, %v1145_v51, 0.0 }
 0x90c   :  { %1158 = vadd.xlane.f32.xlu1 %v1157_v19  ;;  %v1129_v17 = vpop.xlane.xlu1 %1128 }
 0x90d   :  { %v1140_v39 = vsub.f32 %v3127_v0, %v1134_v38  ;;  %v1135_v40 = vmul.f32 0.03125, %v1129_v17 }
 0x90f   :  { %v3154_v43 = vsub.f32 %v3130_v15, %v1135_v40  ;;  %v1146_v44 = vmul.f32 %v1140_v39, %v1140_v39 }
 0x911   :  { %v1160_v41 = vsel %vm158_vm0, %v1146_v44, 0.0  ;;  %v1147_v47 = vmul.f32 %v3154_v43, %v3154_v43 }
 0x912   :  { %1161 = vadd.xlane.f32.xlu0 %v1160_v41 }
 0x913   :  { %v1163_v12 = vsel %vm158_vm0, %v1147_v47, 0.0 }
 0x914   :  { %1164 = vadd.xlane.f32.xlu1 %v1163_v12 }
 0x989   :  { %v1150_v33 = vpop.xlane.xlu0 %1149 }
 0x98a   :  { %v1166_v42 = vmul.f32 0.03125, %v1150_v33 }
 0x98b   :  { %v1153_v52 = vpop.xlane.xlu1 %1152 }
 0x98c   :  { %v1172_v53 = vadd.f32 1e-05, %v1166_v42  ;;  %v1167_v45 = vmul.f32 0.03125, %v1153_v52 }
 0x98e   :  { %2622 = vrsqrt.f32 %v1172_v53  ;;  %v1173_v28 = vadd.f32 1e-05, %v1167_v45 }
 0x990   :  { %2624 = vrsqrt.f32 %v1173_v28 }
 0x997   :  { %v1156_v4 = vpop.xlane.xlu0 %1155 }
 0x998   :  { %v2623_v55 = vpop.eup %2622  ;;  %v1168_v7 = vmul.f32 0.03125, %v1156_v4 }
 0x999   :  { %v1184_v34 = vmul.f32 %v2623_v55, %v1136_v20  ;;  %v1159_v58 = vpop.xlane.xlu1 %1158 }
 0x99a   :  { %v2625_v10 = vpop.eup %2624  ;;  %v1174_v30 = vadd.f32 1e-05, %v1168_v7  ;;  %v1169_v31 = vmul.f32 0.03125, %v1159_v58 }
 0x99b   :  { %v1194_v2 = vmul.f32 %v1193_v60, %v1184_v34  ;;  %v1185_v3 = vmul.f32 %v2625_v10, %v1137_v24 }
 0x99c   :  { %2626 = vrsqrt.f32 %v1174_v30  ;;  %v1175_v23 = vadd.f32 1e-05, %v1169_v31 }
 0x99d   :  { %v1195_v5 = vmul.f32 %v1193_v60, %v1185_v3  ;;  %v1204_v25 = vadd.f32 %v1203_v6, %v1194_v2 }
 0x99e   :  { %2628 = vrsqrt.f32 %v1175_v23 }
 0x99f   :  { %v1205_v26 = vadd.f32 %v1203_v6, %v1195_v5  ;;  %v1162_v14 = vpop.xlane.xlu0 %1161 }
 0x9a0   :  { %v1170_v8 = vmul.f32 0.03125, %v1162_v14 }
 0x9a1   :  { %v1165_v29 = vpop.xlane.xlu1 %1164  ;;  %v1210_v11 = vpack.c.bf16 %v1205_v26, %v1204_v25 }
 0x9a2   :  { %v1176_v20 = vadd.f32 1e-05, %v1170_v8  ;;  %v1171_v37 = vmul.f32 0.03125, %v1165_v29 }
 0x9a3   :  { %2416 = vmatmul.mubr.msk.bf16.vlgmr.msra.gmra.mrb[28].mxu0 %vm158_vm0, %v1210_v11 }
 0x9a4   :  { %2630 = vrsqrt.f32 %v1176_v20  ;;  %v1177_v49 = vadd.f32 1e-05, %v1171_v37  ;;  %2419 = vmatprep.mubr.msk.bf16.mxu0 %vm2724_vm2, %v2723_v61 }
 0x9a6   :  { %v2627_v24 = vpop.eup %2626  ;;  %2632 = vrsqrt.f32 %v1177_v49 }
 0x9a7   :  { %v1186_v18 = vmul.f32 %v2627_v24, %v3141_v36 }
 0x9a8   :  { %v2629_v32 = vpop.eup %2628 }
 0x9a9   :  { %v1187_v51 = vmul.f32 %v2629_v32, %v3144_v9  ;;  %v1196_v27 = vmul.f32 %v1193_v60, %v1186_v18 }
 0x9ab   :  { %v1197_v38 = vmul.f32 %v1193_v60, %v1187_v51  ;;  %v1206_v19 = vadd.f32 %v1203_v6, %v1196_v27 }
 0x9ad   :  { %v1207_v17 = vadd.f32 %v1203_v6, %v1197_v38 }
 0x9ae   :  { %v2631_v40 = vpop.eup %2630 }
 0x9af   :  { %v1188_v44 = vmul.f32 %v2631_v40, %v1140_v39  ;;  %v1211_v41 = vpack.c.bf16 %v1207_v17, %v1206_v19  ;;  %v1216_v39 = vrot.slane %v3171_v62, %v248_v48 }
 0x9b0   :  { %v2633_v47 = vpop.eup %2632 }
 0x9b1   :  { %v1189_v12 = vmul.f32 %v2633_v47, %v3154_v43  ;;  %2420 = vmatmul.mubr.msk.bf16.gmra.mrb[32].mxu0 %vm158_vm0, %v1211_v41  ;;  %v1198_v50 = vmul.f32 %v1193_v60, %v1188_v44 }
 0x9b2   :  { %2423 = vmatprep.mubr.msk.bf16.mxu0 %vm2724_vm2, %v2723_v61 }
 0x9b3   :  { %v1199_v36 = vmul.f32 %v1193_v60, %v1189_v12  ;;  %v1208_v35 = vadd.f32 %v1203_v6, %v1198_v50 }
 0x9b5   :  { %v1209_v33 = vadd.f32 %v1203_v6, %v1199_v36 }
 0x9b7   :  { %v1212_v9 = vpack.c.bf16 %v1209_v33, %v1208_v35 }
 0x9b9   :  { %2424 = vmatmul.mubr.msk.bf16.gmra.mrb[36].mxu0 %vm158_vm0, %v1212_v9 }
 0x9ba   :  { %2447 = vmatprep.mubr.msk.bf16.mxu0 %vm2724_vm2, %v2723_v61 }
 0xa76   :  { %v1272_v43 = vpop.f32.mrb[28].mxu0 }
 0xa77   :  { %v1273_v42 = vadd.f32 %v1272_v43, %v1216_v39  ;;  %v2417_v52 = vpop.f32.mrb[29].mxu0  ;;  %v2539_v43 = vld [vmem:[%s3424_s1 + $0x88] sm:$0xff]  }
 0xa78   :  { %v1275_v53 = vpop.f32.mrb[30].mxu0 }
 0xa79   :  { %v1276_v45 = vadd.f32 %v1275_v53, %v1216_v39  ;;  %1307 = vrot.lane.b32.xlu0 %v1273_v42, %s2725_s22  ;;  %v2418_v28 = vpop.f32.mrb[31].mxu0  ;;  %v1295_v3 = vmul.f32 0.35355338, %v1273_v42 }
 0xa7b   :  { %1309 = vrot.lane.b32.xlu1 %v1276_v45, %s2725_s22  ;;  %v1296_v25 = vmul.f32 0.35355338, %v1276_v45 }
 0xa84   :  { %v1280_v60 = vpop.f32.mrb[32].mxu0 }
 0xa85   :  { %v1281_v4 = vadd.f32 %v1280_v60, %v1216_v39  ;;  %v2421_v55 = vpop.f32.mrb[33].mxu0 }
 0xa86   :  { %v1283_v7 = vpop.f32.mrb[34].mxu0 }
 0xa87   :  { %1311 = vrot.lane.b32.xlu1 %v1281_v4, %s2725_s22  ;;  %v2422_v34 = vpop.f32.mrb[35].mxu0  ;;  %v1284_v58 = vadd.f32 %v1283_v7, %v1216_v39  ;;  %v1297_v18 = vmul.f32 0.35355338, %v1281_v4 }
 0xa89   :  { %v1298_v5 = vmul.f32 0.35355338, %v1284_v58 }
 0xa8b   :  { %1313 = vrot.lane.b32.xlu1 %v1284_v58, %s2725_s22 }
 0xa8c   :  { %v1288_v48 = vpop.f32.mrb[36].mxu0 }
 0xa8d   :  { %v1289_v10 = vadd.f32 %v1288_v48, %v1216_v39  ;;  %v2425_v30 = vpop.f32.mrb[37].mxu0 }
 0xa8e   :  { %v1291_v31 = vpop.f32.mrb[38].mxu0 }
 0xa8f   :  { %v1292_v6 = vadd.f32 %v1291_v31, %v1216_v39  ;;  %1315 = vrot.lane.b32.xlu0 %v1289_v10, %s2725_s22  ;;  %v2426_v2 = vpop.f32.mrb[39].mxu0  ;;  %v1299_v26 = vmul.f32 0.35355338, %v1289_v10  ;;  %v2538_v39 = vld [vmem:[%s3424_s1 + $0x80] sm:$0xff]  }
 0xa90   :  { %2444 = vmatpush3.bf16.msra.mxu0 %v2538_v39 }
 0xa91   :  { %1317 = vrot.lane.b32.xlu1 %v1292_v6, %s2725_s22  ;;  %v1300_v32 = vmul.f32 0.35355338, %v1292_v6  ;;  %2445 = vmatprep.subr.bf16.mxu0 %v2723_v61 }
 0xa93   :  { %1532 = vrot.lane.b32.xlu0 %v1273_v42, %s2726_s23 }
 0xa94   :  { %2446 = vmatpush3.bf16.msra.mxu0 %v2539_v43 }
 0xa95   :  { %1534 = vrot.lane.b32.xlu1 %v1276_v45, %s2726_s23  ;;  %2475 = vmatprep.subr.bf16.mxu0 %v2723_v61 }
 0xa97   :  { %1538 = vrot.lane.b32.xlu0 %v1284_v58, %s2726_s23 }
 0xa99   :  { %1540 = vrot.lane.b32.xlu1 %v1289_v10, %s2726_s23 }
 0xa9b   :  { %1536 = vrot.lane.b32.xlu0 %v1281_v4, %s2726_s23 }
 0xa9d   :  { %1542 = vrot.lane.b32.xlu1 %v1292_v6, %s2726_s23 }
 0xaeb   :  { %v1308_v23 = vpop.permute.xlu0 %1307 }
 0xaec   :  { %v1325_v8 = vmul.f32 %v1308_v23, %v1295_v3  ;;  %v1331_v29 = vmul.f32 %v1308_v23, %v1298_v5 }
 0xaed   :  { %v1310_v14 = vpop.permute.xlu1 %1309 }
 0xaee   :  { %v1326_v11 = vmul.f32 %v1310_v14, %v1296_v25  ;;  %v1332_v20 = vmul.f32 %v1310_v14, %v1299_v26 }
 0xaf0   :  { %v1337_v37 = vpack.c.bf16 %v1326_v11, %v1325_v8  ;;  %v1340_v49 = vpack.c.bf16 %v1332_v20, %v1331_v29 }
 0xaf2   :  { %2431 = vmatprep.mubr.msk.bf16.mxu1 %vm158_vm0, %v1337_v37 }
 0xaf9   :  { %v1312_v24 = vpop.permute.xlu1 %1311 }
 0xafa   :  { %v1327_v27 = vmul.f32 %v1312_v24, %v1297_v18  ;;  %v1333_v38 = vmul.f32 %v1312_v24, %v1300_v32 }
 0xafd   :  { %v1314_v51 = vpop.permute.xlu1 %1313 }
 0xafe   :  { %v1328_v19 = vmul.f32 %v1314_v51, %v1295_v3  ;;  %v1334_v17 = vmul.f32 %v1314_v51, %v1298_v5 }
 0xb00   :  { %v1338_v40 = vpack.c.bf16 %v1328_v19, %v1327_v27  ;;  %v1341_v44 = vpack.c.bf16 %v1334_v17, %v1333_v38 }
 0xb01   :  { %v1316_v41 = vpop.permute.xlu0 %1315 }
 0xb02   :  { %2432 = vmatmul.mubr.msk.bf16.vlgmr.msra.gmra.mrb[36].mxu1 %vm158_vm0, %v1338_v40  ;;  %v1329_v12 = vmul.f32 %v1316_v41, %v1296_v25  ;;  %v1335_v50 = vmul.f32 %v1316_v41, %v1299_v26 }
 0xb03   :  { %v1318_v47 = vpop.permute.xlu1 %1317 }
 0xb04   :  { %v1330_v36 = vmul.f32 %v1318_v47, %v1297_v18  ;;  %v1336_v35 = vmul.f32 %v1318_v47, %v1300_v32 }
 0xb06   :  { %v1339_v33 = vpack.c.bf16 %v1330_v36, %v1329_v12  ;;  %v1342_v9 = vpack.c.bf16 %v1336_v35, %v1335_v50 }
 0xb08   :  { %2435 = vmatprep.mubr.msk.bf16.mxu1 %vm158_vm0, %v1339_v33 }
 0xb0a   :  { %2436 = vmatmul.mubr.msk.bf16.gmra.mrb[40].mxu1 %vm158_vm0, %v1340_v49 }
 0xb0b   :  { %2439 = vmatprep.mubr.msk.bf16.mxu1 %vm158_vm0, %v1341_v44 }
 0xb12   :  { %2440 = vmatmul.mubr.msk.bf16.gmra.mrb[44].mxu1 %vm158_vm0, %v1342_v9 }
 0xb13   :  { %2463 = vmatprep.mubr.msk.bf16.mxu1 %vm2724_vm2, %v2723_v61 }
 0xbd5   :  { %v2433_v42 = vpop.f32.mrb[36].mxu1 }
 0xbd6   :  { %v1395_v52 = vpop.f32.mrb[37].mxu1  ;;  %v1448_v23 = vsel %vm158_vm0, %v2433_v42, -inf }
 0xbd7   :  { %v1442_v53 = vsel %vm158_vm0, %v1395_v52, -inf  ;;  %v2434_v45 = vpop.f32.mrb[38].mxu1 }
 0xbd8   :  { %v1443_v28 = vsel %vm158_vm0, %v2434_v45, -inf  ;;  %v1398_v60 = vpop.f32.mrb[39].mxu1 }
 0xbd9   :  { %v1444_v4 = vmax.f32 %v1442_v53, %v1443_v28  ;;  %v1445_v30 = vsel %vm158_vm0, %v1398_v60, -inf }
 0xbdb   :  { %v1460_v55 = vsub.f32 %v1395_v52, %v1444_v4  ;;  %v1463_v7 = vsub.f32 %v2434_v45, %v1444_v4 }
 0xbdd   :  { %v1472_v34 = vmul.f32 1.442695, %v1460_v55  ;;  %v1478_v58 = vmul.f32 1.442695, %v1463_v7  ;;  %v2437_v48 = vpop.f32.mrb[40].mxu1 }
 0xbde   :  { %v1411_v10 = vpop.f32.mrb[41].mxu1  ;;  %v1451_v35 = vsel %vm158_vm0, %v2437_v48, -inf }
 0xbdf   :  { %2634 = vpow2.f32 %v1472_v34  ;;  %v1446_v31 = vsel %vm158_vm0, %v1411_v10, -inf  ;;  %v2438_v6 = vpop.f32.mrb[42].mxu1 }
 0xbe0   :  { %2636 = vpow2.f32 %v1478_v58  ;;  %v1447_v2 = vmax.f32 %v1445_v30, %v1446_v31  ;;  %v1414_v3 = vpop.f32.mrb[43].mxu1  ;;  %v1454_v37 = vsel %vm158_vm0, %v2438_v6, -inf }
 0xbe1   :  { %v1449_v5 = vsel %vm158_vm0, %v1414_v3, -inf }
 0xbe2   :  { %v1461_v25 = vsub.f32 %v1398_v60, %v1447_v2  ;;  %v1464_v26 = vsub.f32 %v1411_v10, %v1447_v2  ;;  %v1450_v14 = vmax.f32 %v1448_v23, %v1449_v5 }
 0xbe4   :  { %v1474_v8 = vmul.f32 1.442695, %v1461_v25  ;;  %v1480_v29 = vmul.f32 1.442695, %v1464_v26  ;;  %v1462_v11 = vsub.f32 %v2433_v42, %v1450_v14  ;;  %v1465_v20 = vsub.f32 %v1414_v3, %v1450_v14  ;;  %v1535_v14 = vpop.permute.xlu1 %1534 }
 0xbe5   :  { %v2441_v49 = vpop.f32.mrb[44].mxu1 }
 0xbe6   :  { %2638 = vpow2.f32 %v1474_v8  ;;  %v1476_v24 = vmul.f32 1.442695, %v1462_v11  ;;  %v1482_v18 = vmul.f32 1.442695, %v1465_v20  ;;  %v1455_v32 = vsel %vm158_vm0, %v2441_v49, -inf  ;;  %v1427_v51 = vpop.f32.mrb[45].mxu1 }
 0xbe7   :  { %2640 = vpow2.f32 %v1480_v29  ;;  %v1456_v27 = vmax.f32 %v1454_v37, %v1455_v32  ;;  %v1457_v38 = vsel %vm158_vm0, %v1427_v51, -inf  ;;  %v2442_v19 = vpop.f32.mrb[46].mxu1 }
 0xbe8   :  { %2642 = vpow2.f32 %v1476_v24  ;;  %v1458_v17 = vsel %vm158_vm0, %v2442_v19, -inf  ;;  %v1430_v40 = vpop.f32.mrb[47].mxu1 }
 0xbe9   :  { %v2635_v44 = vpop.eup %2634  ;;  %2644 = vpow2.f32 %v1482_v18  ;;  %v1467_v41 = vsub.f32 %v2438_v6, %v1456_v27  ;;  %v1470_v47 = vsub.f32 %v2441_v49, %v1456_v27  ;;  %v1459_v12 = vmax.f32 %v1457_v38, %v1458_v17 }
 0xbea   :  { %v2637_v50 = vpop.eup %2636  ;;  %v1496_v36 = vsel %vm158_vm0, %v2635_v44, 0.0  ;;  %v1452_v33 = vsel %vm158_vm0, %v1430_v40, -inf }
 0xbeb   :  { %v1497_v9 = vsel %vm158_vm0, %v2637_v50, 0.0  ;;  %v1486_v39 = vmul.f32 1.442695, %v1467_v41  ;;  %v1492_v43 = vmul.f32 1.442695, %v1470_v47  ;;  %v1468_v42 = vsub.f32 %v1427_v51, %v1459_v12  ;;  %v1541_v47 = vpop.permute.xlu1 %1540 }
 0xbec   :  { %v1498_v52 = vadd.f32 %v1497_v9, %v1496_v36  ;;  %v1471_v53 = vsub.f32 %v2442_v19, %v1459_v12  ;;  %v1453_v45 = vmax.f32 %v1451_v35, %v1452_v33 }
 0xbed   :  { %2646 = vpow2.f32 %v1486_v39  ;;  %v1488_v28 = vmul.f32 1.442695, %v1468_v42 }
 0xbee   :  { %2648 = vrcp.f32 %v1498_v52  ;;  %v1494_v60 = vmul.f32 1.442695, %v1471_v53  ;;  %v1466_v4 = vsub.f32 %v2437_v48, %v1453_v45  ;;  %v1469_v55 = vsub.f32 %v1430_v40, %v1453_v45  ;;  %v3237_v48 = vpop.permute.xlu0 %1532 }
 0xbef   :  { %2650 = vpow2.f32 %v1492_v43 }
 0xbf0   :  { %v2639_v7 = vpop.eup %2638  ;;  %2652 = vpow2.f32 %v1488_v28  ;;  %v1484_v34 = vmul.f32 1.442695, %v1466_v4  ;;  %v1490_v58 = vmul.f32 1.442695, %v1469_v55  ;;  %v1543_v55 = vpop.permute.xlu1 %1542 }
 0xbf1   :  { %v2641_v10 = vpop.eup %2640  ;;  %v1499_v30 = vsel %vm158_vm0, %v2639_v7, 0.0  ;;  %2654 = vpow2.f32 %v1494_v60 }
 0xbf2   :  { %v2643_v31 = vpop.eup %2642  ;;  %v1500_v6 = vsel %vm158_vm0, %v2641_v10, 0.0  ;;  %2656 = vpow2.f32 %v1484_v34  ;;  %v1539_v24 = vpop.permute.xlu0 %1538 }
 0xbf3   :  { %v2645_v2 = vpop.eup %2644  ;;  %v1501_v3 = vadd.f32 %v1500_v6, %v1499_v30  ;;  %v1502_v23 = vsel %vm158_vm0, %v2643_v31, 0.0  ;;  %2658 = vpow2.f32 %v1490_v58 }
 0xbf4   :  { %v1503_v5 = vsel %vm158_vm0, %v2645_v2, 0.0 }
 0xbf5   :  { %2660 = vrcp.f32 %v1501_v3  ;;  %v1504_v25 = vadd.f32 %v1503_v5, %v1502_v23 }
 0xbf6   :  { %v1537_v4 = vpop.permute.xlu0 %1536 }
 0xbf7   :  { %v2647_v26 = vpop.eup %2646  ;;  %2662 = vrcp.f32 %v1504_v25 }
 0xbf8   :  { %v2649_v8 = vpop.eup %2648  ;;  %v1508_v29 = vsel %vm158_vm0, %v2647_v26, 0.0 }
 0xbf9   :  { %v2651_v11 = vpop.eup %2650  ;;  %v1520_v20 = vmul.f32 %v2649_v8, %v2635_v44  ;;  %v1523_v37 = vmul.f32 %v2649_v8, %v2637_v50 }
 0xbfa   :  { %v2653_v49 = vpop.eup %2652  ;;  %v1509_v18 = vsel %vm158_vm0, %v2651_v11, 0.0 }
 0xbfb   :  { %v2655_v32 = vpop.eup %2654  ;;  %v1550_v51 = vmul.f32 %v3237_v48, %v1520_v20  ;;  %v1553_v27 = vmul.f32 %v1539_v24, %v1523_v37  ;;  %v1510_v38 = vadd.f32 %v1509_v18, %v1508_v29  ;;  %v1511_v19 = vsel %vm158_vm0, %v2653_v49, 0.0 }
 0xbfc   :  { %v2657_v17 = vpop.eup %2656  ;;  %v1512_v40 = vsel %vm158_vm0, %v2655_v32, 0.0 }
 0xbfd   :  { %v2659_v41 = vpop.eup %2658  ;;  %v1562_v12 = vsel %vm158_vm0, %v1550_v51, 0.0  ;;  %v1563_v44 = vsel %vm158_vm0, %v1553_v27, 0.0  ;;  %2664 = vrcp.f32 %v1510_v38  ;;  %v1513_v50 = vadd.f32 %v1512_v40, %v1511_v19 }
 0xbfe   :  { %v1564_v36 = vadd.f32 %v1563_v44, %v1562_v12  ;;  %v1505_v35 = vsel %vm158_vm0, %v2657_v17, 0.0  ;;  %v1506_v33 = vsel %vm158_vm0, %v2659_v41, 0.0 }
 0xbff   :  { %v2661_v9 = vpop.eup %2660  ;;  %2666 = vrcp.f32 %v1513_v50  ;;  %v1507_v39 = vadd.f32 %v1506_v33, %v1505_v35 }
 0xc00   :  { %v1521_v43 = vmul.f32 %v2661_v9, %v2639_v7  ;;  %v1524_v42 = vmul.f32 %v2661_v9, %v2641_v10 }
 0xc01   :  { %v2663_v52 = vpop.eup %2662  ;;  %2668 = vrcp.f32 %v1507_v39 }
 0xc02   :  { %v1551_v53 = vmul.f32 %v1535_v14, %v1521_v43  ;;  %v1554_v45 = vmul.f32 %v1541_v47, %v1524_v42  ;;  %v1525_v28 = vmul.f32 %v2663_v52, %v2645_v2  ;;  %v1522_v60 = vmul.f32 %v2663_v52, %v2643_v31 }
 0xc04   :  { %v1565_v34 = vsel %vm158_vm0, %v1551_v53, 0.0  ;;  %v1566_v58 = vsel %vm158_vm0, %v1554_v45, 0.0  ;;  %v1552_v30 = vmul.f32 %v1537_v4, %v1522_v60  ;;  %v1555_v6 = vmul.f32 %v1543_v55, %v1525_v28 }
 0xc05   :  { %v1567_v3 = vadd.f32 %v1566_v58, %v1565_v34 }
 0xc06   :  { %v1568_v23 = vsel %vm158_vm0, %v1552_v30, 0.0  ;;  %v1569_v7 = vsel %vm158_vm0, %v1555_v6, 0.0 }
 0xc07   :  { %v2665_v10 = vpop.eup %2664  ;;  %v1580_v5 = vpack.c.bf16 %v1567_v3, %v1564_v36  ;;  %v1570_v25 = vadd.f32 %v1569_v7, %v1568_v23 }
 0xc08   :  { %v1530_v8 = vmul.f32 %v2665_v10, %v2651_v11  ;;  %v1527_v29 = vmul.f32 %v2665_v10, %v2647_v26 }
 0xc09   :  { %v2667_v2 = vpop.eup %2666  ;;  %2448 = vmatmul.mubr.msk.bf16.vlgmr.msra.gmra.mrb[40].mxu0 %vm158_vm0, %v1580_v5 }
 0xc0a   :  { %v1531_v31 = vmul.f32 %v2667_v2, %v2655_v32  ;;  %2451 = vmatprep.mubr.msk.bf16.mxu0 %vm2724_vm2, %v2723_v61  ;;  %v1528_v20 = vmul.f32 %v2667_v2, %v2653_v49  ;;  %v1557_v37 = vmul.f32 %v1535_v14, %v1527_v29  ;;  %v1560_v18 = vmul.f32 %v1541_v47, %v1530_v8 }
 0xc0b   :  { %v2669_v51 = vpop.eup %2668 }
 0xc0c   :  { %v1529_v27 = vmul.f32 %v2669_v51, %v2659_v41  ;;  %v1526_v38 = vmul.f32 %v2669_v51, %v2657_v17  ;;  %v1558_v19 = vmul.f32 %v1537_v4, %v1528_v20  ;;  %v1561_v40 = vmul.f32 %v1543_v55, %v1531_v31 }
 0xc0d   :  { %v1574_v12 = vsel %vm158_vm0, %v1557_v37, 0.0  ;;  %v1575_v11 = vsel %vm158_vm0, %v1560_v18, 0.0 }
 0xc0e   :  { %v1556_v26 = vmul.f32 %v3237_v48, %v1526_v38  ;;  %v1559_v44 = vmul.f32 %v1539_v24, %v1529_v27  ;;  %v1576_v50 = vadd.f32 %v1575_v11, %v1574_v12  ;;  %v1577_v32 = vsel %vm158_vm0, %v1558_v19, 0.0 }
 0xc0f   :  { %v1578_v36 = vsel %vm158_vm0, %v1561_v40, 0.0  ;;  %v1670_v48 = vrot.slane %v3171_v62, %v714_v63 }
 0xc10   :  { %v1571_v14 = vsel %vm158_vm0, %v1556_v26, 0.0  ;;  %v1572_v49 = vsel %vm158_vm0, %v1559_v44, 0.0  ;;  %v1579_v41 = vadd.f32 %v1578_v36, %v1577_v32 }
 0xc11   :  { %v1573_v17 = vadd.f32 %v1572_v49, %v1571_v14  ;;  %v2540_v49 = vld [vmem:[%s3425_s2 + $0x30] sm:$0xff]  }
 0xc12   :  { %v1582_v47 = vpack.c.bf16 %v1579_v41, %v1576_v50  ;;  %2460 = vmatpush3.bf16.msra.mxu1 %v2540_v49  ;;  %v2541_v41 = vld [vmem:[%s3425_s2 + $0x38] sm:$0xff]  }
 0xc13   :  { %v1581_v35 = vpack.c.bf16 %v1573_v17, %v1570_v25  ;;  %2461 = vmatprep.subr.bf16.mxu1 %v2723_v61 }
 0xc15   :  { %2452 = vmatmul.mubr.msk.bf16.gmra.mrb[44].mxu0 %vm158_vm0, %v1581_v35 }
 0xc16   :  { %2455 = vmatprep.mubr.msk.bf16.mxu0 %vm2724_vm2, %v2723_v61  ;;  %2462 = vmatpush3.bf16.msra.mxu1 %v2541_v41 }
 0xc17   :  { %2503 = vmatprep.subr.bf16.mxu1 %v2723_v61 }
 0xc1d   :  { %2456 = vmatmul.mubr.msk.bf16.gmra.mrb[48].mxu0 %vm158_vm0, %v1582_v47 }
 0xc1e   :  { %2491 = vmatprep.mubr.msk.bf16.mxu0 %vm2724_vm2, %v2723_v61 }
 0xcdc   :  { %v1638_v24 = vpop.f32.mrb[40].mxu0 }
 0xcdd   :  { %v1661_v33 = vadd.f32 %v1638_v24, %v3107_v46  ;;  %v2449_v9 = vpop.f32.mrb[41].mxu0 }
 0xcde   :  { %v1641_v39 = vpop.f32.mrb[42].mxu0 }
 0xcdf   :  { %v3273_v43 = vadd.f32 %v1670_v48, %v1661_v33  ;;  %v1662_v42 = vadd.f32 %v1641_v39, %v3110_v22  ;;  %v2450_v52 = vpop.f32.mrb[43].mxu0 }
 0xce1   :  { %v1677_v53 = vsel %vm158_vm0, %v3273_v43, 0.0  ;;  %v1672_v45 = vadd.f32 %v1670_v48, %v1662_v42  ;;  %v3309_v42 = vrot.slane %v3171_v62, %v3034_v56 }
 0xce2   :  { %1678 = vadd.xlane.f32.xlu0 %v1677_v53 }
 0xce3   :  { %v1680_v28 = vsel %vm158_vm0, %v1672_v45, 0.0 }
 0xce4   :  { %1681 = vadd.xlane.f32.xlu1 %v1680_v28 }
 0xce8   :  { %v1646_v60 = vpop.f32.mrb[44].mxu0 }
 0xce9   :  { %v1663_v63 = vadd.f32 %v1646_v60, %v3117_v54  ;;  %v2453_v4 = vpop.f32.mrb[45].mxu0 }
 0xcea   :  { %v1649_v46 = vpop.f32.mrb[46].mxu0 }
 0xceb   :  { %v1664_v55 = vadd.f32 %v1649_v46, %v3120_v59  ;;  %v2454_v34 = vpop.f32.mrb[47].mxu0  ;;  %v1673_v58 = vadd.f32 %v1670_v48, %v1663_v63 }
 0xced   :  { %v3281_v30 = vadd.f32 %v1670_v48, %v1664_v55  ;;  %v1683_v22 = vsel %vm158_vm0, %v1673_v58, 0.0  ;;  %v3313_v55 = vrot.slane %v3171_v62, %v3039_v57 }
 0xcee   :  { %1684 = vadd.xlane.f32.xlu0 %v1683_v22 }
 0xcef   :  { %v1686_v7 = vsel %vm158_vm0, %v3281_v30, 0.0 }
 0xcf0   :  { %v1654_v6 = vpop.f32.mrb[48].mxu0 }
 0xcf1   :  { %v1665_v3 = vadd.f32 %v1654_v6, %v3127_v0  ;;  %v2457_v23 = vpop.f32.mrb[49].mxu0 }
 0xcf2   :  { %1687 = vadd.xlane.f32.xlu0 %v1686_v7  ;;  %v1657_v54 = vpop.f32.mrb[50].mxu0 }
 0xcf3   :  { %v1666_v10 = vadd.f32 %v1657_v54, %v3130_v15  ;;  %v2458_v5 = vpop.f32.mrb[51].mxu0  ;;  %v1675_v59 = vadd.f32 %v1670_v48, %v1665_v3 }
 0xcf5   :  { %v3288_v25 = vadd.f32 %v1670_v48, %v1666_v10  ;;  %v1689_v32 = vsel %vm158_vm0, %v1675_v59, 0.0 }
 0xcf7   :  { %v1692_v14 = vsel %vm158_vm0, %v3288_v25, 0.0 }
 0xd6f   :  { %v1679_v8 = vpop.xlane.xlu0 %1678 }
 0xd70   :  { %v1695_v29 = vmul.f32 0.03125, %v1679_v8 }
 0xd71   :  { %v1682_v2 = vpop.xlane.xlu1 %1681 }
 0xd72   :  { %v1701_v31 = vsub.f32 %v3273_v43, %v1695_v29  ;;  %v1696_v20 = vmul.f32 0.03125, %v1682_v2 }
 0xd74   :  { %v1702_v37 = vsub.f32 %v1672_v45, %v1696_v20  ;;  %v1707_v0 = vmul.f32 %v1701_v31, %v1701_v31 }
 0xd76   :  { %v1713_v18 = vsel %vm158_vm0, %v1707_v0, 0.0  ;;  %v1708_v51 = vmul.f32 %v1702_v37, %v1702_v37 }
 0xd77   :  { %1714 = vadd.xlane.f32.xlu0 %v1713_v18 }
 0xd78   :  { %v1716_v27 = vsel %vm158_vm0, %v1708_v51, 0.0 }
 0xd79   :  { %1717 = vadd.xlane.f32.xlu1 %v1716_v27 }
 0xd7b   :  { %v1685_v15 = vpop.xlane.xlu0 %1684 }
 0xd7c   :  { %v1697_v38 = vmul.f32 0.03125, %v1685_v15 }
 0xd7e   :  { %v1703_v19 = vsub.f32 %v1673_v58, %v1697_v38 }
 0xd7f   :  { %v1688_v40 = vpop.xlane.xlu0 %1687 }
 0xd80   :  { %v1698_v12 = vmul.f32 0.03125, %v1688_v40  ;;  %v1709_v11 = vmul.f32 %v1703_v19, %v1703_v19  ;;  %v2543_v40 = vld [vmem:[%s3424_s1 + $0x98] sm:$0xff]  }
 0xd82   :  { %v1704_v26 = vsub.f32 %v3281_v30, %v1698_v12  ;;  %v1719_v44 = vsel %vm158_vm0, %v1709_v11, 0.0  ;;  %v2544_v12 = vld [vmem:[%s3424_s1 + $0xa0] sm:$0xff]   ;;  %v2545_v11 = vld [vmem:[%s3424_s1 + $0xa8] sm:$0xff]  }
 0xd83   :  { %1720 = vadd.xlane.f32.xlu0 %v1719_v44  ;;  %v2547_v44 = vld [vmem:[%s3424_s1 + $0xb8] sm:$0xff]  }
 0xd84   :  { %v1710_v50 = vmul.f32 %v1704_v26, %v1704_v26 }
 0xd86   :  { %v1722_v36 = vsel %vm158_vm0, %v1710_v50, 0.0  ;;  %v2548_v50 = vld [vmem:[%s3424_s1 + $0xc0] sm:$0xff]  }
 0xd87   :  { %1690 = vadd.xlane.f32.xlu0 %v1689_v32  ;;  %1723 = vadd.xlane.f32.xlu1 %v1722_v36  ;;  %v2549_v32 = vld [vmem:[%s3424_s1 + $0xc8] sm:$0xff]  }
 0xd8b   :  { %1693 = vadd.xlane.f32.xlu1 %v1692_v14 }
 0xe04   :  { %v1715_v17 = vpop.xlane.xlu0 %1714 }
 0xe05   :  { %v1731_v47 = vmul.f32 0.03125, %v1715_v17 }
 0xe06   :  { %v1718_v35 = vpop.xlane.xlu1 %1717 }
 0xe07   :  { %v1737_v48 = vadd.f32 1e-05, %v1731_v47  ;;  %v1732_v24 = vmul.f32 0.03125, %v1718_v35 }
 0xe09   :  { %2670 = vrsqrt.f32 %v1737_v48  ;;  %v1738_v33 = vadd.f32 1e-05, %v1732_v24 }
 0xe0b   :  { %2672 = vrsqrt.f32 %v1738_v33 }
 0xe10   :  { %v1721_v9 = vpop.xlane.xlu0 %1720 }
 0xe11   :  { %v1733_v39 = vmul.f32 0.03125, %v1721_v9 }
 0xe13   :  { %v2671_v52 = vpop.eup %2670  ;;  %v1739_v53 = vadd.f32 1e-05, %v1733_v39 }
 0xe14   :  { %v1749_v45 = vmul.f32 %v2671_v52, %v1701_v31  ;;  %v1724_v28 = vpop.xlane.xlu1 %1723  ;;  %v1691_v60 = vpop.xlane.xlu0 %1690 }
 0xe15   :  { %v2673_v63 = vpop.eup %2672  ;;  %2674 = vrsqrt.f32 %v1739_v53  ;;  %v1734_v4 = vmul.f32 0.03125, %v1724_v28  ;;  %v1699_v46 = vmul.f32 0.03125, %v1691_v60  ;;  %v3373_v28 = vrot.slane %v3171_v62, %v825_v1 }
 0xe16   :  { %v1759_v34 = vmul.f32 %v3309_v42, %v1749_v45  ;;  %v1750_v58 = vmul.f32 %v2673_v63, %v1702_v37 }
 0xe17   :  { %v1740_v22 = vadd.f32 1e-05, %v1734_v4  ;;  %v1705_v6 = vsub.f32 %v1675_v59, %v1699_v46 }
 0xe18   :  { %v1760_v3 = vmul.f32 %v3309_v42, %v1750_v58  ;;  %v1694_v23 = vpop.xlane.xlu1 %1693  ;;  %v1769_v10 = vadd.f32 %v3313_v55, %v1759_v34 }
 0xe19   :  { %2676 = vrsqrt.f32 %v1740_v22  ;;  %v1700_v7 = vmul.f32 0.03125, %v1694_v23  ;;  %v1711_v54 = vmul.f32 %v1705_v6, %v1705_v6 }
 0xe1a   :  { %v1770_v5 = vadd.f32 %v3313_v55, %v1760_v3 }
 0xe1b   :  { %v1706_v8 = vsub.f32 %v3288_v25, %v1700_v7  ;;  %v1725_v29 = vsel %vm158_vm0, %v1711_v54, 0.0 }
 0xe1c   :  { %1726 = vadd.xlane.f32.xlu0 %v1725_v29  ;;  %v1775_v2 = vpack.c.bf16 %v1770_v5, %v1769_v10 }
 0xe1d   :  { %v1712_v31 = vmul.f32 %v1706_v8, %v1706_v8 }
 0xe1e   :  { %2464 = vmatmul.mubr.msk.bf16.vlgmr.msra.gmra.mrb[48].mxu1 %vm158_vm0, %v1775_v2 }
 0xe1f   :  { %v2675_v59 = vpop.eup %2674  ;;  %v1728_v20 = vsel %vm158_vm0, %v1712_v31, 0.0  ;;  %2467 = vmatprep.mubr.msk.bf16.mxu1 %vm2724_vm2, %v2723_v61 }
 0xe20   :  { %v1751_v37 = vmul.f32 %v2675_v59, %v1703_v19  ;;  %1729 = vadd.xlane.f32.xlu1 %v1728_v20  ;;  %v2542_v19 = vld [vmem:[%s3424_s1 + $0x90] sm:$0xff]  }
 0xe21   :  { %2476 = vmatpush3.bf16.msra.mxu0 %v2542_v19 }
 0xe22   :  { %v1761_v51 = vmul.f32 %v3309_v42, %v1751_v37  ;;  %2477 = vmatprep.subr.bf16.mxu0 %v2723_v61 }
 0xe23   :  { %v2677_v0 = vpop.eup %2676 }
 0xe24   :  { %v1752_v18 = vmul.f32 %v2677_v0, %v1704_v26  ;;  %v1771_v27 = vadd.f32 %v3313_v55, %v1761_v51  ;;  %v2546_v26 = vld [vmem:[%s3424_s1 + $0xb0] sm:$0xff]  }
 0xe25   :  { %2478 = vmatpush3.bf16.msra.mxu0 %v2543_v40 }
 0xe26   :  { %v1762_v25 = vmul.f32 %v3309_v42, %v1752_v18  ;;  %2479 = vmatprep.subr.bf16.mxu0 %v2723_v61 }
 0xe28   :  { %v1772_v15 = vadd.f32 %v3313_v55, %v1762_v25 }
 0xe29   :  { %2480 = vmatpush3.bf16.msra.mxu0 %v2544_v12 }
 0xe2a   :  { %v1776_v38 = vpack.c.bf16 %v1772_v15, %v1771_v27  ;;  %2481 = vmatprep.subr.bf16.mxu0 %v2723_v61 }
 0xe2c   :  { %2468 = vmatmul.mubr.msk.bf16.gmra.mrb[52].mxu1 %vm158_vm0, %v1776_v38 }
 0xe2d   :  { %2471 = vmatprep.mubr.msk.bf16.mxu1 %vm2724_vm2, %v2723_v61  ;;  %2482 = vmatpush3.bf16.msra.mxu0 %v2545_v11 }
 0xe2e   :  { %2483 = vmatprep.subr.bf16.mxu0 %v2723_v61 }
 0xe31   :  { %2484 = vmatpush3.bf16.msra.mxu0 %v2546_v26 }
 0xe32   :  { %2485 = vmatprep.subr.bf16.mxu0 %v2723_v61 }
 0xe35   :  { %2486 = vmatpush3.bf16.msra.mxu0 %v2547_v44 }
 0xe36   :  { %2487 = vmatprep.subr.bf16.mxu0 %v2723_v61 }
 0xe39   :  { %2488 = vmatpush3.bf16.msra.mxu0 %v2548_v50 }
 0xe3a   :  { %2489 = vmatprep.subr.bf16.mxu0 %v2723_v61 }
 0xe3d   :  { %2490 = vmatpush3.bf16.msra.mxu0 %v2549_v32 }
 0xea9   :  { %v1727_v36 = vpop.xlane.xlu0 %1726 }
 0xeaa   :  { %v1735_v14 = vmul.f32 0.03125, %v1727_v36 }
 0xeac   :  { %v1741_v49 = vadd.f32 1e-05, %v1735_v14 }
 0xead   :  { %v1730_v41 = vpop.xlane.xlu1 %1729 }
 0xeae   :  { %2678 = vrsqrt.f32 %v1741_v49  ;;  %v1736_v17 = vmul.f32 0.03125, %v1730_v41 }
 0xeb0   :  { %v1742_v47 = vadd.f32 1e-05, %v1736_v17 }
 0xeb2   :  { %2680 = vrsqrt.f32 %v1742_v47 }
 0xeb8   :  { %v2679_v35 = vpop.eup %2678 }
 0xeb9   :  { %v1753_v48 = vmul.f32 %v2679_v35, %v1705_v6 }
 0xebb   :  { %v1763_v9 = vmul.f32 %v3309_v42, %v1753_v48 }
 0xebc   :  { %v2681_v24 = vpop.eup %2680 }
 0xebd   :  { %v1754_v33 = vmul.f32 %v2681_v24, %v1706_v8  ;;  %v1773_v52 = vadd.f32 %v3313_v55, %v1763_v9 }
 0xebf   :  { %v1764_v39 = vmul.f32 %v3309_v42, %v1754_v33 }
 0xec1   :  { %v1774_v53 = vadd.f32 %v3313_v55, %v1764_v39 }
 0xec3   :  { %v1777_v45 = vpack.c.bf16 %v1774_v53, %v1773_v52 }
 0xec5   :  { %2472 = vmatmul.mubr.msk.bf16.gmra.mrb[56].mxu1 %vm158_vm0, %v1777_v45 }
 0xec6   :  { %2507 = vmatprep.mubr.msk.bf16.mxu1 %vm2724_vm2, %v2723_v61 }
 0xef1   :  { %v1837_v60 = vpop.f32.mrb[48].mxu1 }
 0xef2   :  { %v1838_v63 = vadd.f32 %v1837_v60, %v3373_v28  ;;  %v2465_v4 = vpop.f32.mrb[49].mxu1 }
 0xef3   :  { %v1840_v42 = vpop.f32.mrb[50].mxu1 }
 0xef4   :  { %v1866_v46 = vmul.f32 0.044715, %v1838_v63  ;;  %v1841_v34 = vadd.f32 %v1840_v42, %v3373_v28  ;;  %v2466_v55 = vpop.f32.mrb[51].mxu1  ;;  %v1860_v12 = vmul.f32 0.5, %v1838_v63 }
 0xef6   :  { %v1872_v58 = vmul.f32 %v1866_v46, %v1838_v63  ;;  %v1867_v22 = vmul.f32 0.044715, %v1841_v34  ;;  %v1861_v11 = vmul.f32 0.5, %v1841_v34 }
 0xef8   :  { %v1878_v6 = vmul.f32 %v1872_v58, %v1838_v63  ;;  %v1873_v3 = vmul.f32 %v1867_v22, %v1841_v34 }
 0xefa   :  { %v1884_v23 = vadd.f32 %v1878_v6, %v1838_v63  ;;  %v1879_v7 = vmul.f32 %v1873_v3, %v1841_v34 }
 0xefc   :  { %v1890_v54 = vmul.f32 0.7978846, %v1884_v23  ;;  %v1885_v10 = vadd.f32 %v1879_v7, %v1841_v34 }
 0xefe   :  { %2682 = vtanh.f32 %v1890_v54  ;;  %v1891_v1 = vmul.f32 0.7978846, %v1885_v10 }
 0xeff   :  { %v1845_v62 = vpop.f32.mrb[52].mxu1 }
 0xf00   :  { %2684 = vtanh.f32 %v1891_v1  ;;  %v1846_v5 = vadd.f32 %v1845_v62, %v3373_v28  ;;  %v2469_v8 = vpop.f32.mrb[53].mxu1 }
 0xf01   :  { %v1848_v29 = vpop.f32.mrb[54].mxu1 }
 0xf02   :  { %v1868_v2 = vmul.f32 0.044715, %v1846_v5  ;;  %v1849_v31 = vadd.f32 %v1848_v29, %v3373_v28  ;;  %v2470_v59 = vpop.f32.mrb[55].mxu1  ;;  %v1862_v17 = vmul.f32 0.5, %v1846_v5 }
 0xf04   :  { %v1874_v20 = vmul.f32 %v1868_v2, %v1846_v5  ;;  %v1869_v37 = vmul.f32 0.044715, %v1849_v31  ;;  %v1863_v47 = vmul.f32 0.5, %v1849_v31 }
 0xf06   :  { %v1880_v0 = vmul.f32 %v1874_v20, %v1846_v5  ;;  %v1875_v18 = vmul.f32 %v1869_v37, %v1849_v31 }
 0xf08   :  { %v2683_v51 = vpop.eup %2682  ;;  %v1881_v25 = vmul.f32 %v1875_v18, %v1849_v31  ;;  %v1886_v27 = vadd.f32 %v1880_v0, %v1846_v5 }
 0xf09   :  { %v1902_v15 = vadd.f32 1.0, %v2683_v51  ;;  %v2697_v51 = vld [vmem:[%s3426_s3 + $0x28] sm:$0xff] }
 0xf0a   :  { %v2685_v38 = vpop.eup %2684  ;;  %v1887_v19 = vadd.f32 %v1881_v25, %v1849_v31  ;;  %v1892_v40 = vmul.f32 0.7978846, %v1886_v27  ;;  %v2023_v25 = vrot.slane %v2697_v51, %v1075_v16 }
 0xf0b   :  { %v1903_v26 = vadd.f32 1.0, %v2685_v38  ;;  %v1908_v50 = vmul.f32 %v1902_v15, %v1860_v12 }
 0xf0c   :  { %v1893_v44 = vmul.f32 0.7978846, %v1887_v19  ;;  %2686 = vtanh.f32 %v1892_v40 }
 0xf0d   :  { %v1909_v32 = vmul.f32 %v1903_v26, %v1861_v11 }
 0xf0e   :  { %2688 = vtanh.f32 %v1893_v44 }
 0xf0f   :  { %v1914_v36 = vpack.c.bf16 %v1909_v32, %v1908_v50 }
 0xf11   :  { %2492 = vmatmul.mubr.bf16.vlgmr.msra.gmra.mrb[52].mxu0 %v1914_v36 }
 0xf12   :  { %2495 = vmatprep.mubr.msk.bf16.mxu0 %vm2724_vm2, %v2723_v61 }
 0xf16   :  { %v2687_v14 = vpop.eup %2686 }
 0xf17   :  { %v1904_v49 = vadd.f32 1.0, %v2687_v14 }
 0xf18   :  { %v2689_v41 = vpop.eup %2688 }
 0xf19   :  { %v1905_v35 = vadd.f32 1.0, %v2689_v41  ;;  %v1910_v48 = vmul.f32 %v1904_v49, %v1862_v17 }
 0xf1b   :  { %v1911_v24 = vmul.f32 %v1905_v35, %v1863_v47  ;;  %v2550_v35 = vld [vmem:[%s3425_s2 + $0x40] sm:$0xff]  }
 0xf1c   :  { %2504 = vmatpush3.bf16.msra.mxu1 %v2550_v35 }
 0xf1d   :  { %v1915_v33 = vpack.c.bf16 %v1911_v24, %v1910_v48  ;;  %2505 = vmatprep.subr.bf16.mxu1 %v2723_v61  ;;  %v2551_v48 = vld [vmem:[%s3425_s2 + $0x48] sm:$0xff]   ;;  %s2727_s2 = smov [#allocation2]  }
 0xf1f   :  { %2496 = vmatmul.mubr.bf16.gmra.mrb[56].mxu0 %v1915_v33 }
 0xf20   :  { %2499 = vmatprep.mubr.msk.bf16.mxu0 %vm2724_vm2, %v2723_v61  ;;  %2506 = vmatpush3.bf16.msra.mxu1 %v2551_v48 }
 0xf98   :  { %v1853_v9 = vpop.f32.mrb[56].mxu1 }
 0xf99   :  { %v1854_v39 = vadd.f32 %v1853_v9, %v3373_v28  ;;  %v2473_v52 = vpop.f32.mrb[57].mxu1 }
 0xf9a   :  { %v1856_v53 = vpop.f32.mrb[58].mxu1 }
 0xf9b   :  { %v1870_v45 = vmul.f32 0.044715, %v1854_v39  ;;  %v1857_v60 = vadd.f32 %v1856_v53, %v3373_v28  ;;  %v2474_v63 = vpop.f32.mrb[59].mxu1  ;;  %v1864_v10 = vmul.f32 0.5, %v1854_v39 }
 0xf9d   :  { %v1876_v4 = vmul.f32 %v1870_v45, %v1854_v39  ;;  %v1871_v42 = vmul.f32 0.044715, %v1857_v60  ;;  %v1865_v1 = vmul.f32 0.5, %v1857_v60 }
 0xf9f   :  { %v1882_v46 = vmul.f32 %v1876_v4, %v1854_v39  ;;  %v1877_v34 = vmul.f32 %v1871_v42, %v1857_v60 }
 0xfa1   :  { %v1883_v55 = vmul.f32 %v1877_v34, %v1857_v60  ;;  %v1888_v58 = vadd.f32 %v1882_v46, %v1854_v39  ;;  %v2698_v39 = vld [vmem:[%s3426_s3 + $0x18] sm:$0xff]  ;;  %s2153_s3 = sshll.u32 %s2727_s2, 4  ;;  %s2154_s3 = int_to_ptr.vmem [resolvable:$true] %s2153_s3 }
 0xfa2   :  { %v2065_v52 = vrot.slane %v2698_v39, %v2853_v21  ;;  %v2071_v45 = vrot.slane %v2698_v39, %v3034_v56  ;;  %v2083_v21 = vrot.slane %v2698_v39, %v3039_v57  ;;  %s2699_s7 = scalar_lea.vmem %s2154_s3, 32  ;;  %p2704_p1 = scmp.lt.s32.totalorder %s2154_s3, %s2154_s3 }
 0xfa3   :  { %v1889_v22 = vadd.f32 %v1883_v55, %v1857_v60  ;;  %v1894_v6 = vmul.f32 0.7978846, %v1888_v58  ;;  %p2700_p0 = scmp.ne.s32.totalorder %s2154_s3, %s2699_s7  ;;  %p2705_p2 = scmp.lt.s32.totalorder %s2699_s7, %s2699_s7 }
 0xfa5   :  { %v1895_v3 = vmul.f32 0.7978846, %v1889_v22  ;;  %2690 = vtanh.f32 %v1894_v6  ;;  %p2706_p3 = por %p2705_p2, %p2704_p1 }
 0xfa7   :  { %2692 = vtanh.f32 %v1895_v3  ;;  %p2707_p4 = pnand %p2706_p3, %p2700_p0 }
 0xfaf   :  { %v2691_v23 = vpop.eup %2690 }
 0xfb0   :  { %v1906_v7 = vadd.f32 1.0, %v2691_v23 }
 0xfb1   :  { %v2693_v54 = vpop.eup %2692 }
 0xfb2   :  { %v1907_v62 = vadd.f32 1.0, %v2693_v54  ;;  %v1912_v5 = vmul.f32 %v1906_v7, %v1864_v10 }
 0xfb4   :  { %v1913_v28 = vmul.f32 %v1907_v62, %v1865_v1 }
 0xfb6   :  { %v1916_v8 = vpack.c.bf16 %v1913_v28, %v1912_v5 }
 0xfb8   :  { %2500 = vmatmul.mubr.bf16.gmra.mrb[60].mxu0 %v1916_v8 }
 0xfe4   :  { %v1999_v29 = vpop.f32.mrb[52].mxu0 }
 0xfe5   :  { %v2493_v2 = vpop.f32.mrb[53].mxu0  ;;  %v2018_v18 = vadd.f32 %v1999_v29, %v3273_v43 }
 0xfe6   :  { %v2002_v31 = vpop.f32.mrb[54].mxu0 }
 0xfe7   :  { %v2494_v59 = vpop.f32.mrb[55].mxu0  ;;  %v2024_v19 = vadd.f32 %v2023_v25, %v2018_v18 }
 0xff2   :  { %v2006_v20 = vpop.f32.mrb[56].mxu0 }
 0xff3   :  { %v2497_v37 = vpop.f32.mrb[57].mxu0 }
 0xff4   :  { %v2008_v0 = vpop.f32.mrb[58].mxu0 }
 0xff5   :  { %v2019_v27 = vadd.f32 %v2008_v0, %v3281_v30  ;;  %v2498_v15 = vpop.f32.mrb[59].mxu0 }
 0xff7   :  { %v2025_v38 = vadd.f32 %v2023_v25, %v2019_v27 }
 0xff9   :  { %v2028_v40 = vrot.slane %v2025_v38, 7 }
 0xffb   :  { %v2030_v12 = vsel %vm2029_vm3, %v2028_v40, %v2024_v19 }
 0xffc   :  { %v2033_v11 = vsel %vm2032_vm4, %v2030_v12, 0.0 }
 0xffd   :  { %2034 = vadd.xlane.f32.xlu0 %v2033_v11 }
0x108a   :  { %v2035_v43 = vpop.xlane.xlu0 %2034 }
0x108b   :  { %v2036_v26 = vmul.f32 0.03125, %v2035_v43  ;;  %v2013_v44 = vpop.f32.mrb[60].mxu0 }
0x108c   :  { %v2501_v50 = vpop.f32.mrb[61].mxu0 }
0x108d   :  { %v2038_v32 = vrot.slane %v2036_v26, 1  ;;  %v2015_v13 = vpop.f32.mrb[62].mxu0  ;;  %v2041_v36 = vsub.f32 %v2024_v19, %v2036_v26 }
0x108e   :  { %v2502_v16 = vpop.f32.mrb[63].mxu0 }
0x108f   :  { %v2042_v30 = vsub.f32 %v2025_v38, %v2038_v32  ;;  %v2043_v49 = vmul.f32 %v2041_v36, %v2041_v36 }
0x1091   :  { %v2044_v14 = vmul.f32 %v2042_v30, %v2042_v30 }
0x1093   :  { %v2047_v41 = vrot.slane %v2044_v14, 7 }
0x1095   :  { %v2048_v17 = vsel %vm2029_vm3, %v2047_v41, %v2043_v49 }
0x1096   :  { %v2050_v47 = vsel %vm2032_vm4, %v2048_v17, 0.0 }
0x1097   :  { %2051 = vadd.xlane.f32.xlu1 %v2050_v47 }
0x1124   :  { %v2052_v24 = vpop.xlane.xlu1 %2051 }
0x1125   :  { %v2053_v33 = vmul.f32 0.03125, %v2052_v24 }
0x1127   :  { %v2054_v9 = vadd.f32 1e-05, %v2053_v33 }
0x1129   :  { %2694 = vrsqrt.f32 %v2054_v9 }
0x1133   :  { %v2695_v53 = vpop.eup %2694 }
0x1134   :  { %v2057_v60 = vrot.slane %v2695_v53, 1  ;;  %v2060_v61 = vmul.f32 %v2695_v53, %v2041_v36 }
0x1136   :  { %v2061_v63 = vmul.f32 %v2057_v60, %v2042_v30  ;;  %v2066_v4 = vmul.f32 %v2065_v52, %v2060_v61 }
0x1138   :  { %v2067_v42 = vmul.f32 %v2065_v52, %v2061_v63  ;;  %v2072_v46 = vadd.f32 %v2071_v45, %v2066_v4 }
0x113a   :  { %v2073_v34 = vadd.f32 %v2071_v45, %v2067_v42  ;;  %v2078_v55 = vpack.c.bf16 %v2072_v46, %v2072_v46 }
0x113c   :  { %v2079_v58 = vpack.c.bf16 %v2073_v34, %v2073_v34  ;;  %v2086_v6 = vunpack.c.l.b16 %v2078_v55 }
0x113e   :  { %v2087_v22 = vunpack.c.l.b16 %v2079_v58 }
0x1140   :  { %v2088_v3 = vrot.slane %v2087_v22, 7 }
0x1142   :  { %v2089_v23 = vsel %vm2029_vm3, %v2088_v3, %v2086_v6 }
0x1143   :  { %v2090_v7 = vpack.c.b16 %v2089_v23, %v2089_v23 }
0x1145   :  { %2508 = vmatmul.mubr.msk.bf16.vlgmr.msra.gmra.mrb[60].mxu1 %vm158_vm0, %v2090_v7 }
0x1218   :  { %v2140_v56 = vpop.f32.mrb[60].mxu1 }
0x1219   :  { %v2141_v54 = vadd.f32 %v2140_v56, %v2083_v21  ;;  %v2509_v10 = vpop.f32.mrb[61].mxu1 }
0x121a   :  { %v2143_v1 = vpop.f32.mrb[62].mxu1 }
0x121b   :  { %2146 = vst [vmem:[#allocation2] sm:$0x3] %v2141_v54  ;;  %v2510_v62 = vpop.f32.mrb[63].mxu1 }
0x121c   :  { %2710 = shalt.err (!%p2707_p4)
}
0x121d   :  { %s2711_s9 = scalar_lea.hbm %s3427_s4, 32 }
0x121e   :  { %p2712_p5 = scmp.ne.s32.totalorder %s3427_s4, %s2711_s9  ;;  %p2715_p6 = scmp.lt.u32.totalorder %s2711_s9, %s3427_s4 }
0x1220   :  { %p2717_p7 = pnand %p2715_p6, %p2712_p5 }
0x1222   :  { %2720 = shalt.err (!%p2717_p7)
}
0x1223   :  { %2156 = dma.vmem_to_hbm [thread:$0]  %s2154_s3, 32, %s3427_s4, [#allocation3]  }
0x1224   :  { %2721 = dma.done.wait [#allocation3], 32  }
0x1225   :  { %2722 = vsyncadd [#allocation3], 4294967264 }
0x1226   :  { %2160 = vsyncpa [#allocation3], 1 }

</bundles_post_ra>
